<compile_context>
chip_gen: v7x
topology: tpu7x:2x2x1
jax: 0.10.0
libtpu: 0.0.40
codegen_flags: <defaults>
</compile_context>

<pallas_src>
import functools
import math

import jax
import jax.numpy as jnp
from jax import lax
from jax.experimental import pallas as pl
from jax.experimental.pallas import tpu as pltpu

# ------------------------- small, shape-consistent config --------------------
VOCAB = 64
CONTEXT_LEN = 16
DIM = 32
N_HEADS = 4
N_LAYERS = 2
HEAD_DIM = DIM // N_HEADS          # 8
HIDDEN = 4 * DIM                   # FeedForward(d_in, 4*d_in) -> 128
EPS = 1e-6
PROJ_PAD = 128                     # 128-lane slab per fused projection block
N_PROJ = 5                         # q, k, v, q_swapped, k_swapped
VOCAB_PAD = 128                    # lane-dense logits store


# ------------------------------ fused kernel ---------------------------------
def _fused_forward_kernel(tok_ref, embed_ref, cos_ref, sin_ref,
                          rms_attn_ref, wqkv_ref, wo_ref, rms_ffn_ref,
                          w13_ref, w2_ref, norm_ref, wout_ref, out_ref):
    f32 = jnp.float32
    bf16 = jnp.bfloat16
    S = tok_ref.shape[0]                     # one batch row per grid step

    def rmsnorm(y, w):
        ms = jnp.mean(y * y, axis=-1, keepdims=True)
        return y * lax.rsqrt(ms + EPS) * w

    def mm(a, w):                            # f32 act x bf16 weight -> f32
        return jnp.dot(a.astype(bf16), w, preferred_element_type=f32)

    # ---- token embedding as a one-hot matmul (gather-free; fine at VOCAB=64)
    tok = tok_ref[...]                                            # (S, 1) i32
    vocab_ids = lax.broadcasted_iota(jnp.int32, (S, VOCAB), 1)
    onehot = (vocab_ids == tok).astype(bf16)                      # (S, VOCAB)
    x = jnp.dot(onehot, embed_ref[...], preferred_element_type=f32)  # (S, DIM)

    cosf = cos_ref[...]            # (S, DIM)  cos, duplicated per pair
    sinf = sin_ref[...]            # (S, DIM)  sin with (-, +) pair sign baked

    rows = lax.broadcasted_iota(jnp.int32, (S, S), 0)
    cols = lax.broadcasted_iota(jnp.int32, (S, S), 1)
    causal = cols <= rows

    for layer in range(N_LAYERS):                   # static unroll (L = 2)
        # ----------------------- attention sub-block ------------------------
        attn_in = rmsnorm(x, rms_attn_ref[layer])
        # one fused matmul -> (q, k, v, q_sw, k_sw), each on a 128-lane slab
        qkv = mm(attn_in, wqkv_ref[layer])          # (S, 5*128) f32
        q    = qkv[:, 0 * PROJ_PAD:0 * PROJ_PAD + DIM]
        k    = qkv[:, 1 * PROJ_PAD:1 * PROJ_PAD + DIM]
        v    = qkv[:, 2 * PROJ_PAD:2 * PROJ_PAD + DIM]
        q_sw = qkv[:, 3 * PROJ_PAD:3 * PROJ_PAD + DIM]
        k_sw = qkv[:, 4 * PROJ_PAD:4 * PROJ_PAD + DIM]
        # RoPE: pure elementwise (pair swap + softmax scale folded into W)
        q = q * cosf + q_sw * sinf
        k = k * cosf + k_sw * sinf

        head_outs = []
        for h in range(N_HEADS):                    # 4 heads, kept in vregs
            c0 = h * HEAD_DIM
            qh = q[:, c0:c0 + HEAD_DIM]
            kh = k[:, c0:c0 + HEAD_DIM]
            vh = v[:, c0:c0 + HEAD_DIM]
            s_ = lax.dot_general(qh.astype(bf16), kh.astype(bf16),
                                 (((1,), (1,)), ((), ())),
                                 preferred_element_type=f32)      # (S, S)
            s_ = jnp.where(causal, s_, -1e30)
            m_ = jnp.max(s_, axis=-1, keepdims=True)
            p_ = jnp.exp(s_ - m_)
            p_ = p_ * pl.reciprocal(jnp.sum(p_, axis=-1, keepdims=True),
                                    approx=True)
            head_outs.append(jnp.dot(p_.astype(bf16), vh.astype(bf16),
                                     preferred_element_type=f32))
        attn_out = jnp.concatenate(head_outs, axis=-1)   # (S, DIM), no VMEM
        h_res = mm(attn_out, wo_ref[layer]) + x          # + residual

        # ----------------------- feed-forward (SwiGLU) ----------------------
        ffn_in = rmsnorm(h_res, rms_ffn_ref[layer])
        g13 = mm(ffn_in, w13_ref[layer])                 # (S, 2*HIDDEN)
        a = g13[:, 0:HIDDEN]                             # 128-aligned split
        silu = a * pl.reciprocal(1.0 + jnp.exp(-a), approx=True)
        g = silu * g13[:, HIDDEN:2 * HIDDEN]
        x = mm(g, w2_ref[layer]) + h_res                 # + residual

    # --------------------------- final norm + output -------------------------
    xn = rmsnorm(x, norm_ref[...])
    out_ref[...] = mm(xn, wout_ref[...])                 # (S, VOCAB_PAD) f32


# ------------------------------ wrapper ---------------------------------------
@jax.jit
def forward(tokens, params):
    B, S = tokens.shape
    M = B * S

    # RoPE tables, batch-independent, (S, DIM):
    #   cos[s, h*hd+2i] = cos[s, h*hd+2i+1] = cos(s, i)
    #   sin[s, h*hd+2i] = -sin(s, i) ; [..+1] = +sin(s, i)
    cos_s = params["cos"][:S]                       # (S, HEAD_DIM//2)
    sin_s = params["sin"][:S]
    cos2 = jnp.repeat(cos_s, 2, axis=-1)            # (S, HEAD_DIM)
    sin2 = jnp.repeat(sin_s, 2, axis=-1)
    sign = jnp.tile(jnp.array([-1.0, 1.0], jnp.float32), HEAD_DIM // 2)
    cos_full = jnp.tile(cos2, (1, N_HEADS))         # (S, DIM)
    sin_full = jnp.tile(sin2 * sign[None, :], (1, N_HEADS))

    tok2d = tokens.reshape(M, 1).astype(jnp.int32)

    def fs(shape):                       # full-array block, constant index_map
        nd = len(shape)
        return pl.BlockSpec(shape, lambda b, _nd=nd: (0,) * _nd)

    logits_pad = pl.pallas_call(
        _fused_forward_kernel,
        out_shape=jax.ShapeDtypeStruct((M, VOCAB_PAD), jnp.float32),
        grid=(B,),
        in_specs=[pl.BlockSpec((S, 1), lambda b: (b, 0)),        # tokens
                  fs(params["embed"].shape),
                  fs((S, DIM)), fs((S, DIM)),                    # cos / sin
                  fs(params["rms_attn"].shape), fs(params["wqkv"].shape),
                  fs(params["wo"].shape), fs(params["rms_ffn"].shape),
                  fs(params["w13"].shape), fs(params["w2"].shape),
                  fs(params["norm"].shape), fs(params["w_out"].shape)],
        out_specs=pl.BlockSpec((S, VOCAB_PAD), lambda b: (b, 0)),
        compiler_params=pltpu.CompilerParams(
            dimension_semantics=("parallel",)),
    )(tok2d, params["embed"], cos_full, sin_full,
      params["rms_attn"], params["wqkv"], params["wo"], params["rms_ffn"],
      params["w13"], params["w2"], params["norm"], params["w_out"])

    return logits_pad[:, :VOCAB].reshape(B, S, VOCAB)


# ------------------------------ parameters -----------------------------------
def precompute_freqs(head_dim, end, theta=10000.0):
    freqs = 1.0 / (theta ** (jnp.arange(0, head_dim, 2, dtype=jnp.float32)
                             / head_dim))
    t = jnp.arange(end, dtype=jnp.float32)
    angles = jnp.outer(t, freqs)                    # (end, head_dim//2)
    return jnp.cos(angles), jnp.sin(angles)


def init_params(key):
    def nrm(k, shape):
        return jax.random.normal(k, shape, dtype=jnp.float32) * 0.02

    keys = jax.random.split(key, 2 + N_LAYERS)
    embed = nrm(keys[0], (VOCAB, DIM))
    w_out = nrm(keys[1], (DIM, VOCAB))
    w_out_pad = jnp.zeros((DIM, VOCAB_PAD), jnp.float32).at[:, :VOCAB].set(w_out)

    # adjacent-pair swap permutation: (x @ swap)[:, c] == x[:, c ^ 1]
    idx = jnp.arange(DIM, dtype=jnp.int32)
    swap = (idx[None, :] == (idx[:, None] ^ 1)).astype(jnp.float32)
    scale = 1.0 / math.sqrt(HEAD_DIM)

    rms_attn, rms_ffn, wqkv, wo, w13, w2 = [], [], [], [], [], []
    for li in range(N_LAYERS):
        lk = jax.random.split(keys[2 + li], 7)
        wq = nrm(lk[0], (DIM, DIM)) * scale          # softmax scale folded in
        wk = nrm(lk[1], (DIM, DIM))
        wv = nrm(lk[2], (DIM, DIM))
        wo_l = nrm(lk[3], (DIM, DIM))
        w1 = nrm(lk[4], (DIM, HIDDEN))
        w3 = nrm(lk[5], (DIM, HIDDEN))
        w2_l = nrm(lk[6], (HIDDEN, DIM))

        # fused projection (q, k, v, q@swap, k@swap), each on a 128-lane slab
        fused = jnp.zeros((DIM, N_PROJ * PROJ_PAD), jnp.float32)
        for c, blk in enumerate([wq, wk, wv, wq @ swap, wk @ swap]):
            fused = fused.at[:, c * PROJ_PAD:c * PROJ_PAD + DIM].set(blk)

        wqkv.append(fused)
        w13.append(jnp.concatenate([w1, w3], axis=1))   # (DIM, 2*HIDDEN)
        wo.append(wo_l)
        w2.append(w2_l)
        rms_attn.append(jnp.ones((1, DIM), jnp.float32))
        rms_ffn.append(jnp.ones((1, DIM), jnp.float32))

    cos, sin = precompute_freqs(HEAD_DIM, CONTEXT_LEN * 2)

    bf16 = jnp.bfloat16
    return {
        "embed": embed.astype(bf16),
        "w_out": w_out_pad.astype(bf16),          # (DIM, VOCAB_PAD)
        "norm": jnp.ones((1, DIM), jnp.float32),
        "cos": cos,
        "sin": sin,
        "rms_attn": jnp.stack(rms_attn),          # (L, 1, DIM) f32
        "rms_ffn": jnp.stack(rms_ffn),            # (L, 1, DIM) f32
        "wqkv": jnp.stack(wqkv).astype(bf16),     # (L, DIM, 5*128)
        "wo": jnp.stack(wo).astype(bf16),         # (L, DIM, DIM)
        "w13": jnp.stack(w13).astype(bf16),       # (L, DIM, 2*HIDDEN)
        "w2": jnp.stack(w2).astype(bf16),         # (L, HIDDEN, DIM)
    }


# --------------------------------- main ---------------------------------------
if __name__ == "__main__":
    key = jax.random.PRNGKey(0)
    pkey, tkey = jax.random.split(key)
    params = init_params(pkey)
    tokens = jax.random.randint(tkey, (2, 8), 0, VOCAB, dtype=jnp.int32)

    logits = forward(tokens, params)
    logits = jax.block_until_ready(logits)

    assert logits.shape == (2, 8, VOCAB)
    assert logits.dtype == jnp.float32
    assert bool(jnp.all(jnp.isfinite(logits)))
    print("KERNEL_OK")
</pallas_src>

<mosaic_0001>
module attributes {stable_mosaic.version = 11 : i64} {
  func.func @_fused_forward_kernel(%arg0: i32, %arg1: memref<8x1xi32, #tpu.memory_space<vmem>>, %arg2: memref<64x32xbf16, #tpu.memory_space<vmem>>, %arg3: memref<8x32xf32, #tpu.memory_space<vmem>>, %arg4: memref<8x32xf32, #tpu.memory_space<vmem>>, %arg5: memref<2x1x32xf32, #tpu.memory_space<vmem>>, %arg6: memref<2x32x640xbf16, #tpu.memory_space<vmem>>, %arg7: memref<2x32x32xbf16, #tpu.memory_space<vmem>>, %arg8: memref<2x1x32xf32, #tpu.memory_space<vmem>>, %arg9: memref<2x32x256xbf16, #tpu.memory_space<vmem>>, %arg10: memref<2x128x32xbf16, #tpu.memory_space<vmem>>, %arg11: memref<1x32xf32, #tpu.memory_space<vmem>>, %arg12: memref<32x128xbf16, #tpu.memory_space<vmem>>, %arg13: memref<8x128xf32, #tpu.memory_space<vmem>>) attributes {dimension_semantics = [#tpu.dimension_semantics<parallel>], iteration_bounds = array<i64: 2>, scalar_prefetch = 0 : i64, scratch_operands = 0 : i64, tpu.core_type = #tpu.core_type<tc>, window_params = [{transform_indices = @transform_0, window_bounds = array<i64: 8, 1>}, {pipeline_mode = #tpu.pipeline_mode<synchronous>, transform_indices = @transform_1, window_bounds = array<i64: 64, 32>}, {pipeline_mode = #tpu.pipeline_mode<synchronous>, transform_indices = @transform_2, window_bounds = array<i64: 8, 32>}, {pipeline_mode = #tpu.pipeline_mode<synchronous>, transform_indices = @transform_3, window_bounds = array<i64: 8, 32>}, {pipeline_mode = #tpu.pipeline_mode<synchronous>, transform_indices = @transform_4, window_bounds = array<i64: 2, 1, 32>}, {pipeline_mode = #tpu.pipeline_mode<synchronous>, transform_indices = @transform_5, window_bounds = array<i64: 2, 32, 640>}, {pipeline_mode = #tpu.pipeline_mode<synchronous>, transform_indices = @transform_6, window_bounds = array<i64: 2, 32, 32>}, {pipeline_mode = #tpu.pipeline_mode<synchronous>, transform_indices = @transform_7, window_bounds = array<i64: 2, 1, 32>}, {pipeline_mode = #tpu.pipeline_mode<synchronous>, transform_indices = @transform_8, window_bounds = array<i64: 2, 32, 256>}, {pipeline_mode = #tpu.pipeline_mode<synchronous>, transform_indices = @transform_9, window_bounds = array<i64: 2, 128, 32>}, {pipeline_mode = #tpu.pipeline_mode<synchronous>, transform_indices = @transform_10, window_bounds = array<i64: 1, 32>}, {pipeline_mode = #tpu.pipeline_mode<synchronous>, transform_indices = @transform_11, window_bounds = array<i64: 32, 128>}, {transform_indices = @transform_12, window_bounds = array<i64: 8, 128>}]} {
    %c0 = arith.constant 0 : index
    %c0_0 = arith.constant 0 : index
    %0 = vector.load %arg1[%c0, %c0_0] : memref<8x1xi32, #tpu.memory_space<vmem>>, vector<8x1xi32>
    %1 = tpu.iota {dimensions = array<i32: 1>} : vector<8x64xi32>
    %2 = vector.broadcast %0 : vector<8x1xi32> to vector<8x64xi32>
    %3 = arith.cmpi eq, %1, %2 : vector<8x64xi32>
    %4 = arith.extui %3 : vector<8x64xi1> to vector<8x64xi32>
    %5 = arith.sitofp %4 : vector<8x64xi32> to vector<8x64xf32>
    %6 = arith.truncf %5 : vector<8x64xf32> to vector<8x64xbf16>
    %c0_1 = arith.constant 0 : index
    %c0_2 = arith.constant 0 : index
    %7 = vector.load %arg2[%c0_1, %c0_2] : memref<64x32xbf16, #tpu.memory_space<vmem>>, vector<64x32xbf16>
    %cst = arith.constant dense<0.000000e+00> : vector<8x32xf32>
    %8 = tpu.matmul %6, %7, %cst {dimension_numbers = #tpu.dot_dimension_numbers<[1], [0], [0], [1], [0, 0, 1, 1], [], []>} : vector<8x64xbf16>, vector<64x32xbf16>, vector<8x32xf32> -> vector<8x32xf32>
    %c0_3 = arith.constant 0 : index
    %c0_4 = arith.constant 0 : index
    %9 = vector.load %arg3[%c0_3, %c0_4] : memref<8x32xf32, #tpu.memory_space<vmem>>, vector<8x32xf32>
    %c0_5 = arith.constant 0 : index
    %c0_6 = arith.constant 0 : index
    %10 = vector.load %arg4[%c0_5, %c0_6] : memref<8x32xf32, #tpu.memory_space<vmem>>, vector<8x32xf32>
    %11 = tpu.iota {dimensions = array<i32: 0>} : vector<8x8xi32>
    %12 = tpu.iota {dimensions = array<i32: 1>} : vector<8x8xi32>
    %13 = arith.cmpi sle, %12, %11 : vector<8x8xi32>
    %c0_7 = arith.constant 0 : index
    %c0_8 = arith.constant 0 : index
    %c0_9 = arith.constant 0 : index
    %14 = vector.load %arg5[%c0_7, %c0_8, %c0_9] : memref<2x1x32xf32, #tpu.memory_space<vmem>>, vector<1x1x32xf32>
    %15 = vector.shape_cast %14 : vector<1x1x32xf32> to vector<1x32xf32>
    %16 = arith.mulf %8, %8 : vector<8x32xf32>
    %cst_10 = arith.constant dense<0.000000e+00> : vector<8xf32>
    %17 = vector.multi_reduction <add>, %16, %cst_10 [1] : vector<8x32xf32> to vector<8xf32>
    %18 = vector.shape_cast %17 : vector<8xf32> to vector<8x1xf32>
    %cst_11 = arith.constant 3.200000e+01 : f32
    %19 = vector.broadcast %cst_11 : f32 to vector<8x1xf32>
    %20 = arith.divf %18, %19 : vector<8x1xf32>
    %cst_12 = arith.constant 9.99999997E-7 : f32
    %21 = vector.broadcast %cst_12 : f32 to vector<8x1xf32>
    %22 = arith.addf %20, %21 : vector<8x1xf32>
    %23 = math.rsqrt %22 : vector<8x1xf32>
    %24 = vector.broadcast %23 : vector<8x1xf32> to vector<8x32xf32>
    %25 = arith.mulf %8, %24 : vector<8x32xf32>
    %26 = vector.broadcast %15 : vector<1x32xf32> to vector<8x32xf32>
    %27 = arith.mulf %25, %26 : vector<8x32xf32>
    %c0_13 = arith.constant 0 : index
    %c0_14 = arith.constant 0 : index
    %c0_15 = arith.constant 0 : index
    %28 = vector.load %arg6[%c0_13, %c0_14, %c0_15] : memref<2x32x640xbf16, #tpu.memory_space<vmem>>, vector<1x32x640xbf16>
    %29 = vector.shape_cast %28 : vector<1x32x640xbf16> to vector<32x640xbf16>
    %30 = arith.truncf %27 : vector<8x32xf32> to vector<8x32xbf16>
    %cst_16 = arith.constant dense<0.000000e+00> : vector<8x640xf32>
    %31 = tpu.matmul %30, %29, %cst_16 {dimension_numbers = #tpu.dot_dimension_numbers<[1], [0], [0], [1], [0, 0, 1, 1], [], []>} : vector<8x32xbf16>, vector<32x640xbf16>, vector<8x640xf32> -> vector<8x640xf32>
    %32 = vector.extract_strided_slice %31 {offsets = [0, 0], sizes = [8, 32], strides = [1, 1]} : vector<8x640xf32> to vector<8x32xf32>
    %33 = vector.extract_strided_slice %31 {offsets = [0, 128], sizes = [8, 32], strides = [1, 1]} : vector<8x640xf32> to vector<8x32xf32>
    %34 = vector.extract_strided_slice %31 {offsets = [0, 256], sizes = [8, 32], strides = [1, 1]} : vector<8x640xf32> to vector<8x32xf32>
    %35 = vector.extract_strided_slice %31 {offsets = [0, 384], sizes = [8, 32], strides = [1, 1]} : vector<8x640xf32> to vector<8x32xf32>
    %36 = vector.extract_strided_slice %31 {offsets = [0, 512], sizes = [8, 32], strides = [1, 1]} : vector<8x640xf32> to vector<8x32xf32>
    %37 = arith.mulf %32, %9 : vector<8x32xf32>
    %38 = arith.mulf %35, %10 : vector<8x32xf32>
    %39 = arith.addf %37, %38 : vector<8x32xf32>
    %40 = arith.mulf %33, %9 : vector<8x32xf32>
    %41 = arith.mulf %36, %10 : vector<8x32xf32>
    %42 = arith.addf %40, %41 : vector<8x32xf32>
    %43 = vector.extract_strided_slice %39 {offsets = [0, 0], sizes = [8, 8], strides = [1, 1]} : vector<8x32xf32> to vector<8x8xf32>
    %44 = vector.extract_strided_slice %42 {offsets = [0, 0], sizes = [8, 8], strides = [1, 1]} : vector<8x32xf32> to vector<8x8xf32>
    %45 = vector.extract_strided_slice %34 {offsets = [0, 0], sizes = [8, 8], strides = [1, 1]} : vector<8x32xf32> to vector<8x8xf32>
    %46 = arith.truncf %43 : vector<8x8xf32> to vector<8x8xbf16>
    %47 = arith.truncf %44 : vector<8x8xf32> to vector<8x8xbf16>
    %cst_17 = arith.constant dense<0.000000e+00> : vector<8x8xf32>
    %48 = tpu.matmul %46, %47, %cst_17 {dimension_numbers = #tpu.dot_dimension_numbers<[1], [1], [0], [0], [0, 0, 1, 0], [], []>} : vector<8x8xbf16>, vector<8x8xbf16>, vector<8x8xf32> -> vector<8x8xf32>
    %cst_18 = arith.constant -1.000000e+30 : f32
    %49 = vector.broadcast %cst_18 : f32 to vector<8x8xf32>
    %50 = arith.select %13, %48, %49 : vector<8x8xi1>, vector<8x8xf32>
    %cst_19 = arith.constant dense<0xFF800000> : vector<8xf32>
    %51 = vector.multi_reduction <maximumf>, %50, %cst_19 [1] : vector<8x8xf32> to vector<8xf32>
    %52 = vector.shape_cast %51 : vector<8xf32> to vector<8x1xf32>
    %53 = vector.broadcast %52 : vector<8x1xf32> to vector<8x8xf32>
    %54 = arith.subf %50, %53 : vector<8x8xf32>
    %55 = math.exp %54 : vector<8x8xf32>
    %cst_20 = arith.constant dense<0.000000e+00> : vector<8xf32>
    %56 = vector.multi_reduction <add>, %55, %cst_20 [1] : vector<8x8xf32> to vector<8xf32>
    %57 = vector.shape_cast %56 : vector<8xf32> to vector<8x1xf32>
    %58 = tpu.reciprocal %57 {approx = true} : vector<8x1xf32> -> vector<8x1xf32>
    %59 = vector.broadcast %58 : vector<8x1xf32> to vector<8x8xf32>
    %60 = arith.mulf %55, %59 : vector<8x8xf32>
    %61 = arith.truncf %60 : vector<8x8xf32> to vector<8x8xbf16>
    %62 = arith.truncf %45 : vector<8x8xf32> to vector<8x8xbf16>
    %cst_21 = arith.constant dense<0.000000e+00> : vector<8x8xf32>
    %63 = tpu.matmul %61, %62, %cst_21 {dimension_numbers = #tpu.dot_dimension_numbers<[1], [0], [0], [1], [0, 0, 1, 1], [], []>} : vector<8x8xbf16>, vector<8x8xbf16>, vector<8x8xf32> -> vector<8x8xf32>
    %64 = vector.extract_strided_slice %39 {offsets = [0, 8], sizes = [8, 8], strides = [1, 1]} : vector<8x32xf32> to vector<8x8xf32>
    %65 = vector.extract_strided_slice %42 {offsets = [0, 8], sizes = [8, 8], strides = [1, 1]} : vector<8x32xf32> to vector<8x8xf32>
    %66 = vector.extract_strided_slice %34 {offsets = [0, 8], sizes = [8, 8], strides = [1, 1]} : vector<8x32xf32> to vector<8x8xf32>
    %67 = arith.truncf %64 : vector<8x8xf32> to vector<8x8xbf16>
    %68 = arith.truncf %65 : vector<8x8xf32> to vector<8x8xbf16>
    %cst_22 = arith.constant dense<0.000000e+00> : vector<8x8xf32>
    %69 = tpu.matmul %67, %68, %cst_22 {dimension_numbers = #tpu.dot_dimension_numbers<[1], [1], [0], [0], [0, 0, 1, 0], [], []>} : vector<8x8xbf16>, vector<8x8xbf16>, vector<8x8xf32> -> vector<8x8xf32>
    %cst_23 = arith.constant -1.000000e+30 : f32
    %70 = vector.broadcast %cst_23 : f32 to vector<8x8xf32>
    %71 = arith.select %13, %69, %70 : vector<8x8xi1>, vector<8x8xf32>
    %cst_24 = arith.constant dense<0xFF800000> : vector<8xf32>
    %72 = vector.multi_reduction <maximumf>, %71, %cst_24 [1] : vector<8x8xf32> to vector<8xf32>
    %73 = vector.shape_cast %72 : vector<8xf32> to vector<8x1xf32>
    %74 = vector.broadcast %73 : vector<8x1xf32> to vector<8x8xf32>
    %75 = arith.subf %71, %74 : vector<8x8xf32>
    %76 = math.exp %75 : vector<8x8xf32>
    %cst_25 = arith.constant dense<0.000000e+00> : vector<8xf32>
    %77 = vector.multi_reduction <add>, %76, %cst_25 [1] : vector<8x8xf32> to vector<8xf32>
    %78 = vector.shape_cast %77 : vector<8xf32> to vector<8x1xf32>
    %79 = tpu.reciprocal %78 {approx = true} : vector<8x1xf32> -> vector<8x1xf32>
    %80 = vector.broadcast %79 : vector<8x1xf32> to vector<8x8xf32>
    %81 = arith.mulf %76, %80 : vector<8x8xf32>
    %82 = arith.truncf %81 : vector<8x8xf32> to vector<8x8xbf16>
    %83 = arith.truncf %66 : vector<8x8xf32> to vector<8x8xbf16>
    %cst_26 = arith.constant dense<0.000000e+00> : vector<8x8xf32>
    %84 = tpu.matmul %82, %83, %cst_26 {dimension_numbers = #tpu.dot_dimension_numbers<[1], [0], [0], [1], [0, 0, 1, 1], [], []>} : vector<8x8xbf16>, vector<8x8xbf16>, vector<8x8xf32> -> vector<8x8xf32>
    %85 = vector.extract_strided_slice %39 {offsets = [0, 16], sizes = [8, 8], strides = [1, 1]} : vector<8x32xf32> to vector<8x8xf32>
    %86 = vector.extract_strided_slice %42 {offsets = [0, 16], sizes = [8, 8], strides = [1, 1]} : vector<8x32xf32> to vector<8x8xf32>
    %87 = vector.extract_strided_slice %34 {offsets = [0, 16], sizes = [8, 8], strides = [1, 1]} : vector<8x32xf32> to vector<8x8xf32>
    %88 = arith.truncf %85 : vector<8x8xf32> to vector<8x8xbf16>
    %89 = arith.truncf %86 : vector<8x8xf32> to vector<8x8xbf16>
    %cst_27 = arith.constant dense<0.000000e+00> : vector<8x8xf32>
    %90 = tpu.matmul %88, %89, %cst_27 {dimension_numbers = #tpu.dot_dimension_numbers<[1], [1], [0], [0], [0, 0, 1, 0], [], []>} : vector<8x8xbf16>, vector<8x8xbf16>, vector<8x8xf32> -> vector<8x8xf32>
    %cst_28 = arith.constant -1.000000e+30 : f32
    %91 = vector.broadcast %cst_28 : f32 to vector<8x8xf32>
    %92 = arith.select %13, %90, %91 : vector<8x8xi1>, vector<8x8xf32>
    %cst_29 = arith.constant dense<0xFF800000> : vector<8xf32>
    %93 = vector.multi_reduction <maximumf>, %92, %cst_29 [1] : vector<8x8xf32> to vector<8xf32>
    %94 = vector.shape_cast %93 : vector<8xf32> to vector<8x1xf32>
    %95 = vector.broadcast %94 : vector<8x1xf32> to vector<8x8xf32>
    %96 = arith.subf %92, %95 : vector<8x8xf32>
    %97 = math.exp %96 : vector<8x8xf32>
    %cst_30 = arith.constant dense<0.000000e+00> : vector<8xf32>
    %98 = vector.multi_reduction <add>, %97, %cst_30 [1] : vector<8x8xf32> to vector<8xf32>
    %99 = vector.shape_cast %98 : vector<8xf32> to vector<8x1xf32>
    %100 = tpu.reciprocal %99 {approx = true} : vector<8x1xf32> -> vector<8x1xf32>
    %101 = vector.broadcast %100 : vector<8x1xf32> to vector<8x8xf32>
    %102 = arith.mulf %97, %101 : vector<8x8xf32>
    %103 = arith.truncf %102 : vector<8x8xf32> to vector<8x8xbf16>
    %104 = arith.truncf %87 : vector<8x8xf32> to vector<8x8xbf16>
    %cst_31 = arith.constant dense<0.000000e+00> : vector<8x8xf32>
    %105 = tpu.matmul %103, %104, %cst_31 {dimension_numbers = #tpu.dot_dimension_numbers<[1], [0], [0], [1], [0, 0, 1, 1], [], []>} : vector<8x8xbf16>, vector<8x8xbf16>, vector<8x8xf32> -> vector<8x8xf32>
    %106 = vector.extract_strided_slice %39 {offsets = [0, 24], sizes = [8, 8], strides = [1, 1]} : vector<8x32xf32> to vector<8x8xf32>
    %107 = vector.extract_strided_slice %42 {offsets = [0, 24], sizes = [8, 8], strides = [1, 1]} : vector<8x32xf32> to vector<8x8xf32>
    %108 = vector.extract_strided_slice %34 {offsets = [0, 24], sizes = [8, 8], strides = [1, 1]} : vector<8x32xf32> to vector<8x8xf32>
    %109 = arith.truncf %106 : vector<8x8xf32> to vector<8x8xbf16>
    %110 = arith.truncf %107 : vector<8x8xf32> to vector<8x8xbf16>
    %cst_32 = arith.constant dense<0.000000e+00> : vector<8x8xf32>
    %111 = tpu.matmul %109, %110, %cst_32 {dimension_numbers = #tpu.dot_dimension_numbers<[1], [1], [0], [0], [0, 0, 1, 0], [], []>} : vector<8x8xbf16>, vector<8x8xbf16>, vector<8x8xf32> -> vector<8x8xf32>
    %cst_33 = arith.constant -1.000000e+30 : f32
    %112 = vector.broadcast %cst_33 : f32 to vector<8x8xf32>
    %113 = arith.select %13, %111, %112 : vector<8x8xi1>, vector<8x8xf32>
    %cst_34 = arith.constant dense<0xFF800000> : vector<8xf32>
    %114 = vector.multi_reduction <maximumf>, %113, %cst_34 [1] : vector<8x8xf32> to vector<8xf32>
    %115 = vector.shape_cast %114 : vector<8xf32> to vector<8x1xf32>
    %116 = vector.broadcast %115 : vector<8x1xf32> to vector<8x8xf32>
    %117 = arith.subf %113, %116 : vector<8x8xf32>
    %118 = math.exp %117 : vector<8x8xf32>
    %cst_35 = arith.constant dense<0.000000e+00> : vector<8xf32>
    %119 = vector.multi_reduction <add>, %118, %cst_35 [1] : vector<8x8xf32> to vector<8xf32>
    %120 = vector.shape_cast %119 : vector<8xf32> to vector<8x1xf32>
    %121 = tpu.reciprocal %120 {approx = true} : vector<8x1xf32> -> vector<8x1xf32>
    %122 = vector.broadcast %121 : vector<8x1xf32> to vector<8x8xf32>
    %123 = arith.mulf %118, %122 : vector<8x8xf32>
    %124 = arith.truncf %123 : vector<8x8xf32> to vector<8x8xbf16>
    %125 = arith.truncf %108 : vector<8x8xf32> to vector<8x8xbf16>
    %cst_36 = arith.constant dense<0.000000e+00> : vector<8x8xf32>
    %126 = tpu.matmul %124, %125, %cst_36 {dimension_numbers = #tpu.dot_dimension_numbers<[1], [0], [0], [1], [0, 0, 1, 1], [], []>} : vector<8x8xbf16>, vector<8x8xbf16>, vector<8x8xf32> -> vector<8x8xf32>
    %127 = tpu.concatenate %63, %84, %105, %126 in 1 : vector<8x8xf32>, vector<8x8xf32>, vector<8x8xf32>, vector<8x8xf32> -> vector<8x32xf32>
    %c0_37 = arith.constant 0 : index
    %c0_38 = arith.constant 0 : index
    %c0_39 = arith.constant 0 : index
    %128 = vector.load %arg7[%c0_37, %c0_38, %c0_39] : memref<2x32x32xbf16, #tpu.memory_space<vmem>>, vector<1x32x32xbf16>
    %129 = vector.shape_cast %128 : vector<1x32x32xbf16> to vector<32x32xbf16>
    %130 = arith.truncf %127 : vector<8x32xf32> to vector<8x32xbf16>
    %cst_40 = arith.constant dense<0.000000e+00> : vector<8x32xf32>
    %131 = tpu.matmul %130, %129, %cst_40 {dimension_numbers = #tpu.dot_dimension_numbers<[1], [0], [0], [1], [0, 0, 1, 1], [], []>} : vector<8x32xbf16>, vector<32x32xbf16>, vector<8x32xf32> -> vector<8x32xf32>
    %132 = arith.addf %131, %8 : vector<8x32xf32>
    %c0_41 = arith.constant 0 : index
    %c0_42 = arith.constant 0 : index
    %c0_43 = arith.constant 0 : index
    %133 = vector.load %arg8[%c0_41, %c0_42, %c0_43] : memref<2x1x32xf32, #tpu.memory_space<vmem>>, vector<1x1x32xf32>
    %134 = vector.shape_cast %133 : vector<1x1x32xf32> to vector<1x32xf32>
    %135 = arith.mulf %132, %132 : vector<8x32xf32>
    %cst_44 = arith.constant dense<0.000000e+00> : vector<8xf32>
    %136 = vector.multi_reduction <add>, %135, %cst_44 [1] : vector<8x32xf32> to vector<8xf32>
    %137 = vector.shape_cast %136 : vector<8xf32> to vector<8x1xf32>
    %cst_45 = arith.constant 3.200000e+01 : f32
    %138 = vector.broadcast %cst_45 : f32 to vector<8x1xf32>
    %139 = arith.divf %137, %138 : vector<8x1xf32>
    %cst_46 = arith.constant 9.99999997E-7 : f32
    %140 = vector.broadcast %cst_46 : f32 to vector<8x1xf32>
    %141 = arith.addf %139, %140 : vector<8x1xf32>
    %142 = math.rsqrt %141 : vector<8x1xf32>
    %143 = vector.broadcast %142 : vector<8x1xf32> to vector<8x32xf32>
    %144 = arith.mulf %132, %143 : vector<8x32xf32>
    %145 = vector.broadcast %134 : vector<1x32xf32> to vector<8x32xf32>
    %146 = arith.mulf %144, %145 : vector<8x32xf32>
    %c0_47 = arith.constant 0 : index
    %c0_48 = arith.constant 0 : index
    %c0_49 = arith.constant 0 : index
    %147 = vector.load %arg9[%c0_47, %c0_48, %c0_49] : memref<2x32x256xbf16, #tpu.memory_space<vmem>>, vector<1x32x256xbf16>
    %148 = vector.shape_cast %147 : vector<1x32x256xbf16> to vector<32x256xbf16>
    %149 = arith.truncf %146 : vector<8x32xf32> to vector<8x32xbf16>
    %cst_50 = arith.constant dense<0.000000e+00> : vector<8x256xf32>
    %150 = tpu.matmul %149, %148, %cst_50 {dimension_numbers = #tpu.dot_dimension_numbers<[1], [0], [0], [1], [0, 0, 1, 1], [], []>} : vector<8x32xbf16>, vector<32x256xbf16>, vector<8x256xf32> -> vector<8x256xf32>
    %151 = vector.extract_strided_slice %150 {offsets = [0, 0], sizes = [8, 128], strides = [1, 1]} : vector<8x256xf32> to vector<8x128xf32>
    %cst_51 = arith.constant 0.000000e+00 : f32
    %152 = vector.broadcast %cst_51 : f32 to vector<8x128xf32>
    %153 = arith.subf %152, %151 : vector<8x128xf32>
    %154 = math.exp %153 : vector<8x128xf32>
    %cst_52 = arith.constant 1.000000e+00 : f32
    %155 = vector.broadcast %cst_52 : f32 to vector<8x128xf32>
    %156 = arith.addf %155, %154 : vector<8x128xf32>
    %157 = tpu.reciprocal %156 {approx = true} : vector<8x128xf32> -> vector<8x128xf32>
    %158 = arith.mulf %151, %157 : vector<8x128xf32>
    %159 = vector.extract_strided_slice %150 {offsets = [0, 128], sizes = [8, 128], strides = [1, 1]} : vector<8x256xf32> to vector<8x128xf32>
    %160 = arith.mulf %158, %159 : vector<8x128xf32>
    %c0_53 = arith.constant 0 : index
    %c0_54 = arith.constant 0 : index
    %c0_55 = arith.constant 0 : index
    %161 = vector.load %arg10[%c0_53, %c0_54, %c0_55] : memref<2x128x32xbf16, #tpu.memory_space<vmem>>, vector<1x128x32xbf16>
    %162 = vector.shape_cast %161 : vector<1x128x32xbf16> to vector<128x32xbf16>
    %163 = arith.truncf %160 : vector<8x128xf32> to vector<8x128xbf16>
    %cst_56 = arith.constant dense<0.000000e+00> : vector<8x32xf32>
    %164 = tpu.matmul %163, %162, %cst_56 {dimension_numbers = #tpu.dot_dimension_numbers<[1], [0], [0], [1], [0, 0, 1, 1], [], []>} : vector<8x128xbf16>, vector<128x32xbf16>, vector<8x32xf32> -> vector<8x32xf32>
    %165 = arith.addf %164, %132 : vector<8x32xf32>
    %c1 = arith.constant 1 : index
    %c0_57 = arith.constant 0 : index
    %c0_58 = arith.constant 0 : index
    %166 = vector.load %arg5[%c1, %c0_57, %c0_58] : memref<2x1x32xf32, #tpu.memory_space<vmem>>, vector<1x1x32xf32>
    %167 = vector.shape_cast %166 : vector<1x1x32xf32> to vector<1x32xf32>
    %168 = arith.mulf %165, %165 : vector<8x32xf32>
    %cst_59 = arith.constant dense<0.000000e+00> : vector<8xf32>
    %169 = vector.multi_reduction <add>, %168, %cst_59 [1] : vector<8x32xf32> to vector<8xf32>
    %170 = vector.shape_cast %169 : vector<8xf32> to vector<8x1xf32>
    %cst_60 = arith.constant 3.200000e+01 : f32
    %171 = vector.broadcast %cst_60 : f32 to vector<8x1xf32>
    %172 = arith.divf %170, %171 : vector<8x1xf32>
    %cst_61 = arith.constant 9.99999997E-7 : f32
    %173 = vector.broadcast %cst_61 : f32 to vector<8x1xf32>
    %174 = arith.addf %172, %173 : vector<8x1xf32>
    %175 = math.rsqrt %174 : vector<8x1xf32>
    %176 = vector.broadcast %175 : vector<8x1xf32> to vector<8x32xf32>
    %177 = arith.mulf %165, %176 : vector<8x32xf32>
    %178 = vector.broadcast %167 : vector<1x32xf32> to vector<8x32xf32>
    %179 = arith.mulf %177, %178 : vector<8x32xf32>
    %c1_62 = arith.constant 1 : index
    %c0_63 = arith.constant 0 : index
    %c0_64 = arith.constant 0 : index
    %180 = vector.load %arg6[%c1_62, %c0_63, %c0_64] : memref<2x32x640xbf16, #tpu.memory_space<vmem>>, vector<1x32x640xbf16>
    %181 = vector.shape_cast %180 : vector<1x32x640xbf16> to vector<32x640xbf16>
    %182 = arith.truncf %179 : vector<8x32xf32> to vector<8x32xbf16>
    %cst_65 = arith.constant dense<0.000000e+00> : vector<8x640xf32>
    %183 = tpu.matmul %182, %181, %cst_65 {dimension_numbers = #tpu.dot_dimension_numbers<[1], [0], [0], [1], [0, 0, 1, 1], [], []>} : vector<8x32xbf16>, vector<32x640xbf16>, vector<8x640xf32> -> vector<8x640xf32>
    %184 = vector.extract_strided_slice %183 {offsets = [0, 0], sizes = [8, 32], strides = [1, 1]} : vector<8x640xf32> to vector<8x32xf32>
    %185 = vector.extract_strided_slice %183 {offsets = [0, 128], sizes = [8, 32], strides = [1, 1]} : vector<8x640xf32> to vector<8x32xf32>
    %186 = vector.extract_strided_slice %183 {offsets = [0, 256], sizes = [8, 32], strides = [1, 1]} : vector<8x640xf32> to vector<8x32xf32>
    %187 = vector.extract_strided_slice %183 {offsets = [0, 384], sizes = [8, 32], strides = [1, 1]} : vector<8x640xf32> to vector<8x32xf32>
    %188 = vector.extract_strided_slice %183 {offsets = [0, 512], sizes = [8, 32], strides = [1, 1]} : vector<8x640xf32> to vector<8x32xf32>
    %189 = arith.mulf %184, %9 : vector<8x32xf32>
    %190 = arith.mulf %187, %10 : vector<8x32xf32>
    %191 = arith.addf %189, %190 : vector<8x32xf32>
    %192 = arith.mulf %185, %9 : vector<8x32xf32>
    %193 = arith.mulf %188, %10 : vector<8x32xf32>
    %194 = arith.addf %192, %193 : vector<8x32xf32>
    %195 = vector.extract_strided_slice %191 {offsets = [0, 0], sizes = [8, 8], strides = [1, 1]} : vector<8x32xf32> to vector<8x8xf32>
    %196 = vector.extract_strided_slice %194 {offsets = [0, 0], sizes = [8, 8], strides = [1, 1]} : vector<8x32xf32> to vector<8x8xf32>
    %197 = vector.extract_strided_slice %186 {offsets = [0, 0], sizes = [8, 8], strides = [1, 1]} : vector<8x32xf32> to vector<8x8xf32>
    %198 = arith.truncf %195 : vector<8x8xf32> to vector<8x8xbf16>
    %199 = arith.truncf %196 : vector<8x8xf32> to vector<8x8xbf16>
    %cst_66 = arith.constant dense<0.000000e+00> : vector<8x8xf32>
    %200 = tpu.matmul %198, %199, %cst_66 {dimension_numbers = #tpu.dot_dimension_numbers<[1], [1], [0], [0], [0, 0, 1, 0], [], []>} : vector<8x8xbf16>, vector<8x8xbf16>, vector<8x8xf32> -> vector<8x8xf32>
    %cst_67 = arith.constant -1.000000e+30 : f32
    %201 = vector.broadcast %cst_67 : f32 to vector<8x8xf32>
    %202 = arith.select %13, %200, %201 : vector<8x8xi1>, vector<8x8xf32>
    %cst_68 = arith.constant dense<0xFF800000> : vector<8xf32>
    %203 = vector.multi_reduction <maximumf>, %202, %cst_68 [1] : vector<8x8xf32> to vector<8xf32>
    %204 = vector.shape_cast %203 : vector<8xf32> to vector<8x1xf32>
    %205 = vector.broadcast %204 : vector<8x1xf32> to vector<8x8xf32>
    %206 = arith.subf %202, %205 : vector<8x8xf32>
    %207 = math.exp %206 : vector<8x8xf32>
    %cst_69 = arith.constant dense<0.000000e+00> : vector<8xf32>
    %208 = vector.multi_reduction <add>, %207, %cst_69 [1] : vector<8x8xf32> to vector<8xf32>
    %209 = vector.shape_cast %208 : vector<8xf32> to vector<8x1xf32>
    %210 = tpu.reciprocal %209 {approx = true} : vector<8x1xf32> -> vector<8x1xf32>
    %211 = vector.broadcast %210 : vector<8x1xf32> to vector<8x8xf32>
    %212 = arith.mulf %207, %211 : vector<8x8xf32>
    %213 = arith.truncf %212 : vector<8x8xf32> to vector<8x8xbf16>
    %214 = arith.truncf %197 : vector<8x8xf32> to vector<8x8xbf16>
    %cst_70 = arith.constant dense<0.000000e+00> : vector<8x8xf32>
    %215 = tpu.matmul %213, %214, %cst_70 {dimension_numbers = #tpu.dot_dimension_numbers<[1], [0], [0], [1], [0, 0, 1, 1], [], []>} : vector<8x8xbf16>, vector<8x8xbf16>, vector<8x8xf32> -> vector<8x8xf32>
    %216 = vector.extract_strided_slice %191 {offsets = [0, 8], sizes = [8, 8], strides = [1, 1]} : vector<8x32xf32> to vector<8x8xf32>
    %217 = vector.extract_strided_slice %194 {offsets = [0, 8], sizes = [8, 8], strides = [1, 1]} : vector<8x32xf32> to vector<8x8xf32>
    %218 = vector.extract_strided_slice %186 {offsets = [0, 8], sizes = [8, 8], strides = [1, 1]} : vector<8x32xf32> to vector<8x8xf32>
    %219 = arith.truncf %216 : vector<8x8xf32> to vector<8x8xbf16>
    %220 = arith.truncf %217 : vector<8x8xf32> to vector<8x8xbf16>
    %cst_71 = arith.constant dense<0.000000e+00> : vector<8x8xf32>
    %221 = tpu.matmul %219, %220, %cst_71 {dimension_numbers = #tpu.dot_dimension_numbers<[1], [1], [0], [0], [0, 0, 1, 0], [], []>} : vector<8x8xbf16>, vector<8x8xbf16>, vector<8x8xf32> -> vector<8x8xf32>
    %cst_72 = arith.constant -1.000000e+30 : f32
    %222 = vector.broadcast %cst_72 : f32 to vector<8x8xf32>
    %223 = arith.select %13, %221, %222 : vector<8x8xi1>, vector<8x8xf32>
    %cst_73 = arith.constant dense<0xFF800000> : vector<8xf32>
    %224 = vector.multi_reduction <maximumf>, %223, %cst_73 [1] : vector<8x8xf32> to vector<8xf32>
    %225 = vector.shape_cast %224 : vector<8xf32> to vector<8x1xf32>
    %226 = vector.broadcast %225 : vector<8x1xf32> to vector<8x8xf32>
    %227 = arith.subf %223, %226 : vector<8x8xf32>
    %228 = math.exp %227 : vector<8x8xf32>
    %cst_74 = arith.constant dense<0.000000e+00> : vector<8xf32>
    %229 = vector.multi_reduction <add>, %228, %cst_74 [1] : vector<8x8xf32> to vector<8xf32>
    %230 = vector.shape_cast %229 : vector<8xf32> to vector<8x1xf32>
    %231 = tpu.reciprocal %230 {approx = true} : vector<8x1xf32> -> vector<8x1xf32>
    %232 = vector.broadcast %231 : vector<8x1xf32> to vector<8x8xf32>
    %233 = arith.mulf %228, %232 : vector<8x8xf32>
    %234 = arith.truncf %233 : vector<8x8xf32> to vector<8x8xbf16>
    %235 = arith.truncf %218 : vector<8x8xf32> to vector<8x8xbf16>
    %cst_75 = arith.constant dense<0.000000e+00> : vector<8x8xf32>
    %236 = tpu.matmul %234, %235, %cst_75 {dimension_numbers = #tpu.dot_dimension_numbers<[1], [0], [0], [1], [0, 0, 1, 1], [], []>} : vector<8x8xbf16>, vector<8x8xbf16>, vector<8x8xf32> -> vector<8x8xf32>
    %237 = vector.extract_strided_slice %191 {offsets = [0, 16], sizes = [8, 8], strides = [1, 1]} : vector<8x32xf32> to vector<8x8xf32>
    %238 = vector.extract_strided_slice %194 {offsets = [0, 16], sizes = [8, 8], strides = [1, 1]} : vector<8x32xf32> to vector<8x8xf32>
    %239 = vector.extract_strided_slice %186 {offsets = [0, 16], sizes = [8, 8], strides = [1, 1]} : vector<8x32xf32> to vector<8x8xf32>
    %240 = arith.truncf %237 : vector<8x8xf32> to vector<8x8xbf16>
    %241 = arith.truncf %238 : vector<8x8xf32> to vector<8x8xbf16>
    %cst_76 = arith.constant dense<0.000000e+00> : vector<8x8xf32>
    %242 = tpu.matmul %240, %241, %cst_76 {dimension_numbers = #tpu.dot_dimension_numbers<[1], [1], [0], [0], [0, 0, 1, 0], [], []>} : vector<8x8xbf16>, vector<8x8xbf16>, vector<8x8xf32> -> vector<8x8xf32>
    %cst_77 = arith.constant -1.000000e+30 : f32
    %243 = vector.broadcast %cst_77 : f32 to vector<8x8xf32>
    %244 = arith.select %13, %242, %243 : vector<8x8xi1>, vector<8x8xf32>
    %cst_78 = arith.constant dense<0xFF800000> : vector<8xf32>
    %245 = vector.multi_reduction <maximumf>, %244, %cst_78 [1] : vector<8x8xf32> to vector<8xf32>
    %246 = vector.shape_cast %245 : vector<8xf32> to vector<8x1xf32>
    %247 = vector.broadcast %246 : vector<8x1xf32> to vector<8x8xf32>
    %248 = arith.subf %244, %247 : vector<8x8xf32>
    %249 = math.exp %248 : vector<8x8xf32>
    %cst_79 = arith.constant dense<0.000000e+00> : vector<8xf32>
    %250 = vector.multi_reduction <add>, %249, %cst_79 [1] : vector<8x8xf32> to vector<8xf32>
    %251 = vector.shape_cast %250 : vector<8xf32> to vector<8x1xf32>
    %252 = tpu.reciprocal %251 {approx = true} : vector<8x1xf32> -> vector<8x1xf32>
    %253 = vector.broadcast %252 : vector<8x1xf32> to vector<8x8xf32>
    %254 = arith.mulf %249, %253 : vector<8x8xf32>
    %255 = arith.truncf %254 : vector<8x8xf32> to vector<8x8xbf16>
    %256 = arith.truncf %239 : vector<8x8xf32> to vector<8x8xbf16>
    %cst_80 = arith.constant dense<0.000000e+00> : vector<8x8xf32>
    %257 = tpu.matmul %255, %256, %cst_80 {dimension_numbers = #tpu.dot_dimension_numbers<[1], [0], [0], [1], [0, 0, 1, 1], [], []>} : vector<8x8xbf16>, vector<8x8xbf16>, vector<8x8xf32> -> vector<8x8xf32>
    %258 = vector.extract_strided_slice %191 {offsets = [0, 24], sizes = [8, 8], strides = [1, 1]} : vector<8x32xf32> to vector<8x8xf32>
    %259 = vector.extract_strided_slice %194 {offsets = [0, 24], sizes = [8, 8], strides = [1, 1]} : vector<8x32xf32> to vector<8x8xf32>
    %260 = vector.extract_strided_slice %186 {offsets = [0, 24], sizes = [8, 8], strides = [1, 1]} : vector<8x32xf32> to vector<8x8xf32>
    %261 = arith.truncf %258 : vector<8x8xf32> to vector<8x8xbf16>
    %262 = arith.truncf %259 : vector<8x8xf32> to vector<8x8xbf16>
    %cst_81 = arith.constant dense<0.000000e+00> : vector<8x8xf32>
    %263 = tpu.matmul %261, %262, %cst_81 {dimension_numbers = #tpu.dot_dimension_numbers<[1], [1], [0], [0], [0, 0, 1, 0], [], []>} : vector<8x8xbf16>, vector<8x8xbf16>, vector<8x8xf32> -> vector<8x8xf32>
    %cst_82 = arith.constant -1.000000e+30 : f32
    %264 = vector.broadcast %cst_82 : f32 to vector<8x8xf32>
    %265 = arith.select %13, %263, %264 : vector<8x8xi1>, vector<8x8xf32>
    %cst_83 = arith.constant dense<0xFF800000> : vector<8xf32>
    %266 = vector.multi_reduction <maximumf>, %265, %cst_83 [1] : vector<8x8xf32> to vector<8xf32>
    %267 = vector.shape_cast %266 : vector<8xf32> to vector<8x1xf32>
    %268 = vector.broadcast %267 : vector<8x1xf32> to vector<8x8xf32>
    %269 = arith.subf %265, %268 : vector<8x8xf32>
    %270 = math.exp %269 : vector<8x8xf32>
    %cst_84 = arith.constant dense<0.000000e+00> : vector<8xf32>
    %271 = vector.multi_reduction <add>, %270, %cst_84 [1] : vector<8x8xf32> to vector<8xf32>
    %272 = vector.shape_cast %271 : vector<8xf32> to vector<8x1xf32>
    %273 = tpu.reciprocal %272 {approx = true} : vector<8x1xf32> -> vector<8x1xf32>
    %274 = vector.broadcast %273 : vector<8x1xf32> to vector<8x8xf32>
    %275 = arith.mulf %270, %274 : vector<8x8xf32>
    %276 = arith.truncf %275 : vector<8x8xf32> to vector<8x8xbf16>
    %277 = arith.truncf %260 : vector<8x8xf32> to vector<8x8xbf16>
    %cst_85 = arith.constant dense<0.000000e+00> : vector<8x8xf32>
    %278 = tpu.matmul %276, %277, %cst_85 {dimension_numbers = #tpu.dot_dimension_numbers<[1], [0], [0], [1], [0, 0, 1, 1], [], []>} : vector<8x8xbf16>, vector<8x8xbf16>, vector<8x8xf32> -> vector<8x8xf32>
    %279 = tpu.concatenate %215, %236, %257, %278 in 1 : vector<8x8xf32>, vector<8x8xf32>, vector<8x8xf32>, vector<8x8xf32> -> vector<8x32xf32>
    %c1_86 = arith.constant 1 : index
    %c0_87 = arith.constant 0 : index
    %c0_88 = arith.constant 0 : index
    %280 = vector.load %arg7[%c1_86, %c0_87, %c0_88] : memref<2x32x32xbf16, #tpu.memory_space<vmem>>, vector<1x32x32xbf16>
    %281 = vector.shape_cast %280 : vector<1x32x32xbf16> to vector<32x32xbf16>
    %282 = arith.truncf %279 : vector<8x32xf32> to vector<8x32xbf16>
    %cst_89 = arith.constant dense<0.000000e+00> : vector<8x32xf32>
    %283 = tpu.matmul %282, %281, %cst_89 {dimension_numbers = #tpu.dot_dimension_numbers<[1], [0], [0], [1], [0, 0, 1, 1], [], []>} : vector<8x32xbf16>, vector<32x32xbf16>, vector<8x32xf32> -> vector<8x32xf32>
    %284 = arith.addf %283, %165 : vector<8x32xf32>
    %c1_90 = arith.constant 1 : index
    %c0_91 = arith.constant 0 : index
    %c0_92 = arith.constant 0 : index
    %285 = vector.load %arg8[%c1_90, %c0_91, %c0_92] : memref<2x1x32xf32, #tpu.memory_space<vmem>>, vector<1x1x32xf32>
    %286 = vector.shape_cast %285 : vector<1x1x32xf32> to vector<1x32xf32>
    %287 = arith.mulf %284, %284 : vector<8x32xf32>
    %cst_93 = arith.constant dense<0.000000e+00> : vector<8xf32>
    %288 = vector.multi_reduction <add>, %287, %cst_93 [1] : vector<8x32xf32> to vector<8xf32>
    %289 = vector.shape_cast %288 : vector<8xf32> to vector<8x1xf32>
    %cst_94 = arith.constant 3.200000e+01 : f32
    %290 = vector.broadcast %cst_94 : f32 to vector<8x1xf32>
    %291 = arith.divf %289, %290 : vector<8x1xf32>
    %cst_95 = arith.constant 9.99999997E-7 : f32
    %292 = vector.broadcast %cst_95 : f32 to vector<8x1xf32>
    %293 = arith.addf %291, %292 : vector<8x1xf32>
    %294 = math.rsqrt %293 : vector<8x1xf32>
    %295 = vector.broadcast %294 : vector<8x1xf32> to vector<8x32xf32>
    %296 = arith.mulf %284, %295 : vector<8x32xf32>
    %297 = vector.broadcast %286 : vector<1x32xf32> to vector<8x32xf32>
    %298 = arith.mulf %296, %297 : vector<8x32xf32>
    %c1_96 = arith.constant 1 : index
    %c0_97 = arith.constant 0 : index
    %c0_98 = arith.constant 0 : index
    %299 = vector.load %arg9[%c1_96, %c0_97, %c0_98] : memref<2x32x256xbf16, #tpu.memory_space<vmem>>, vector<1x32x256xbf16>
    %300 = vector.shape_cast %299 : vector<1x32x256xbf16> to vector<32x256xbf16>
    %301 = arith.truncf %298 : vector<8x32xf32> to vector<8x32xbf16>
    %cst_99 = arith.constant dense<0.000000e+00> : vector<8x256xf32>
    %302 = tpu.matmul %301, %300, %cst_99 {dimension_numbers = #tpu.dot_dimension_numbers<[1], [0], [0], [1], [0, 0, 1, 1], [], []>} : vector<8x32xbf16>, vector<32x256xbf16>, vector<8x256xf32> -> vector<8x256xf32>
    %303 = vector.extract_strided_slice %302 {offsets = [0, 0], sizes = [8, 128], strides = [1, 1]} : vector<8x256xf32> to vector<8x128xf32>
    %cst_100 = arith.constant 0.000000e+00 : f32
    %304 = vector.broadcast %cst_100 : f32 to vector<8x128xf32>
    %305 = arith.subf %304, %303 : vector<8x128xf32>
    %306 = math.exp %305 : vector<8x128xf32>
    %cst_101 = arith.constant 1.000000e+00 : f32
    %307 = vector.broadcast %cst_101 : f32 to vector<8x128xf32>
    %308 = arith.addf %307, %306 : vector<8x128xf32>
    %309 = tpu.reciprocal %308 {approx = true} : vector<8x128xf32> -> vector<8x128xf32>
    %310 = arith.mulf %303, %309 : vector<8x128xf32>
    %311 = vector.extract_strided_slice %302 {offsets = [0, 128], sizes = [8, 128], strides = [1, 1]} : vector<8x256xf32> to vector<8x128xf32>
    %312 = arith.mulf %310, %311 : vector<8x128xf32>
    %c1_102 = arith.constant 1 : index
    %c0_103 = arith.constant 0 : index
    %c0_104 = arith.constant 0 : index
    %313 = vector.load %arg10[%c1_102, %c0_103, %c0_104] : memref<2x128x32xbf16, #tpu.memory_space<vmem>>, vector<1x128x32xbf16>
    %314 = vector.shape_cast %313 : vector<1x128x32xbf16> to vector<128x32xbf16>
    %315 = arith.truncf %312 : vector<8x128xf32> to vector<8x128xbf16>
    %cst_105 = arith.constant dense<0.000000e+00> : vector<8x32xf32>
    %316 = tpu.matmul %315, %314, %cst_105 {dimension_numbers = #tpu.dot_dimension_numbers<[1], [0], [0], [1], [0, 0, 1, 1], [], []>} : vector<8x128xbf16>, vector<128x32xbf16>, vector<8x32xf32> -> vector<8x32xf32>
    %317 = arith.addf %316, %284 : vector<8x32xf32>
    %c0_106 = arith.constant 0 : index
    %c0_107 = arith.constant 0 : index
    %318 = vector.load %arg11[%c0_106, %c0_107] : memref<1x32xf32, #tpu.memory_space<vmem>>, vector<1x32xf32>
    %319 = arith.mulf %317, %317 : vector<8x32xf32>
    %cst_108 = arith.constant dense<0.000000e+00> : vector<8xf32>
    %320 = vector.multi_reduction <add>, %319, %cst_108 [1] : vector<8x32xf32> to vector<8xf32>
    %321 = vector.shape_cast %320 : vector<8xf32> to vector<8x1xf32>
    %cst_109 = arith.constant 3.200000e+01 : f32
    %322 = vector.broadcast %cst_109 : f32 to vector<8x1xf32>
    %323 = arith.divf %321, %322 : vector<8x1xf32>
    %cst_110 = arith.constant 9.99999997E-7 : f32
    %324 = vector.broadcast %cst_110 : f32 to vector<8x1xf32>
    %325 = arith.addf %323, %324 : vector<8x1xf32>
    %326 = math.rsqrt %325 : vector<8x1xf32>
    %327 = vector.broadcast %326 : vector<8x1xf32> to vector<8x32xf32>
    %328 = arith.mulf %317, %327 : vector<8x32xf32>
    %329 = vector.broadcast %318 : vector<1x32xf32> to vector<8x32xf32>
    %330 = arith.mulf %328, %329 : vector<8x32xf32>
    %c0_111 = arith.constant 0 : index
    %c0_112 = arith.constant 0 : index
    %331 = vector.load %arg12[%c0_111, %c0_112] : memref<32x128xbf16, #tpu.memory_space<vmem>>, vector<32x128xbf16>
    %332 = arith.truncf %330 : vector<8x32xf32> to vector<8x32xbf16>
    %cst_113 = arith.constant dense<0.000000e+00> : vector<8x128xf32>
    %333 = tpu.matmul %332, %331, %cst_113 {dimension_numbers = #tpu.dot_dimension_numbers<[1], [0], [0], [1], [0, 0, 1, 1], [], []>} : vector<8x32xbf16>, vector<32x128xbf16>, vector<8x128xf32> -> vector<8x128xf32>
    %c0_114 = arith.constant 0 : index
    %c0_115 = arith.constant 0 : index
    %334 = vector.load %arg13[%c0_114, %c0_115] : memref<8x128xf32, #tpu.memory_space<vmem>>, vector<8x128xf32>
    tpu.vector_store %arg13[%c0_114, %c0_115], %333 {strides = array<i32>} : memref<8x128xf32, #tpu.memory_space<vmem>>, vector<8x128xf32>,
    return
  }
  func.func @transform_0(%arg0: i32) -> (i32, i32) {
    %c0_i32 = arith.constant 0 : i32
    %c0_i32_0 = arith.constant 0 : i32
    return %arg0, %c0_i32 : i32, i32
  }
  func.func @transform_1(%arg0: i32) -> (i32, i32) {
    %c0_i32 = arith.constant 0 : i32
    %c0_i32_0 = arith.constant 0 : i32
    %c0_i32_1 = arith.constant 0 : i32
    return %c0_i32, %c0_i32_0 : i32, i32
  }
  func.func @transform_2(%arg0: i32) -> (i32, i32) {
    %c0_i32 = arith.constant 0 : i32
    %c0_i32_0 = arith.constant 0 : i32
    %c0_i32_1 = arith.constant 0 : i32
    return %c0_i32, %c0_i32_0 : i32, i32
  }
  func.func @transform_3(%arg0: i32) -> (i32, i32) {
    %c0_i32 = arith.constant 0 : i32
    %c0_i32_0 = arith.constant 0 : i32
    %c0_i32_1 = arith.constant 0 : i32
    return %c0_i32, %c0_i32_0 : i32, i32
  }
  func.func @transform_4(%arg0: i32) -> (i32, i32, i32) {
    %c0_i32 = arith.constant 0 : i32
    %c0_i32_0 = arith.constant 0 : i32
    %c0_i32_1 = arith.constant 0 : i32
    %c0_i32_2 = arith.constant 0 : i32
    return %c0_i32, %c0_i32_0, %c0_i32_1 : i32, i32, i32
  }
  func.func @transform_5(%arg0: i32) -> (i32, i32, i32) {
    %c0_i32 = arith.constant 0 : i32
    %c0_i32_0 = arith.constant 0 : i32
    %c0_i32_1 = arith.constant 0 : i32
    %c0_i32_2 = arith.constant 0 : i32
    return %c0_i32, %c0_i32_0, %c0_i32_1 : i32, i32, i32
  }
  func.func @transform_6(%arg0: i32) -> (i32, i32, i32) {
    %c0_i32 = arith.constant 0 : i32
    %c0_i32_0 = arith.constant 0 : i32
    %c0_i32_1 = arith.constant 0 : i32
    %c0_i32_2 = arith.constant 0 : i32
    return %c0_i32, %c0_i32_0, %c0_i32_1 : i32, i32, i32
  }
  func.func @transform_7(%arg0: i32) -> (i32, i32, i32) {
    %c0_i32 = arith.constant 0 : i32
    %c0_i32_0 = arith.constant 0 : i32
    %c0_i32_1 = arith.constant 0 : i32
    %c0_i32_2 = arith.constant 0 : i32
    return %c0_i32, %c0_i32_0, %c0_i32_1 : i32, i32, i32
  }
  func.func @transform_8(%arg0: i32) -> (i32, i32, i32) {
    %c0_i32 = arith.constant 0 : i32
    %c0_i32_0 = arith.constant 0 : i32
    %c0_i32_1 = arith.constant 0 : i32
    %c0_i32_2 = arith.constant 0 : i32
    return %c0_i32, %c0_i32_0, %c0_i32_1 : i32, i32, i32
  }
  func.func @transform_9(%arg0: i32) -> (i32, i32, i32) {
    %c0_i32 = arith.constant 0 : i32
    %c0_i32_0 = arith.constant 0 : i32
    %c0_i32_1 = arith.constant 0 : i32
    %c0_i32_2 = arith.constant 0 : i32
    return %c0_i32, %c0_i32_0, %c0_i32_1 : i32, i32, i32
  }
  func.func @transform_10(%arg0: i32) -> (i32, i32) {
    %c0_i32 = arith.constant 0 : i32
    %c0_i32_0 = arith.constant 0 : i32
    %c0_i32_1 = arith.constant 0 : i32
    return %c0_i32, %c0_i32_0 : i32, i32
  }
  func.func @transform_11(%arg0: i32) -> (i32, i32) {
    %c0_i32 = arith.constant 0 : i32
    %c0_i32_0 = arith.constant 0 : i32
    %c0_i32_1 = arith.constant 0 : i32
    return %c0_i32, %c0_i32_0 : i32, i32
  }
  func.func @transform_12(%arg0: i32) -> (i32, i32) {
    %c0_i32 = arith.constant 0 : i32
    %c0_i32_0 = arith.constant 0 : i32
    return %arg0, %c0_i32 : i32, i32
  }
}

</mosaic_0001>

<bundles_post_ra>
// kernel: tile.15
= control target key start
LH: loop header
LB: loop body
LE: loop exit
PB: predicated region body
PF: predicated region fallthrough
CT: control target
= control target key end

     0   :  { %s22_s0 = inlined_call_operand.vmem [shape: f32[2], index: 0, kind: input, shape index: {}]   ;;  %s23_s1 = inlined_call_operand.vmem [shape: f32[4,2], index: 1, kind: output, shape index: {}]  }
   0x1   :  { %v4_v0 = vld [vmem:[%s22_s0] ss:$0 sm:$0xff] }
   0x2   :  { %5 = vst [vmem:[%s23_s1] sm:$0xf] %v4_v0 }

// kernel: tile.25
= control target key start
LH: loop header
LB: loop body
LE: loop exit
PB: predicated region body
PF: predicated region fallthrough
CT: control target
= control target key end

     0   :  { %vm42_vm0 = vcmask 1047556   ;;  %vm44_vm1 = vcmask 64512   ;;  %s93_s22 = smov 8   ;;  %s94_s25 = smov 16   ;;  %vm54_vm2 = vcmask 261312   ;;  %vm64_vm3 = vcmask 195712   ;;  %s146_s0 = inlined_call_operand.vmem [shape: f32[8,4,8], index: 0, kind: input, shape index: {}]   ;;  %s147_s1 = inlined_call_operand.vmem [shape: f32[8,32], index: 1, kind: output, shape index: {}]  }
   0x1   :  { %v82_v0 = vld [vmem:[%s146_s0 + $0x1c] sm:$0xf]  ;;  %v83_v1 = vld [vmem:[%s146_s0 + $0x18] sm:$0xf]  ;;  %v84_v2 = vld [vmem:[%s146_s0 + $0x14] sm:$0xf] }
   0x2   :  { %8 = vst [vmem:[#allocation0 + $0x38] sm:$0xf] %v82_v0  ;;  %13 = vst [vmem:[#allocation0 + $0x30] sm:$0xf] %v83_v1  ;;  %v85_v3 = vld [vmem:[%s146_s0 + $0x10] sm:$0xf] }
   0x3   :  { %18 = vst [vmem:[#allocation0 + $0x28] sm:$0xf] %v84_v2  ;;  %v86_v4 = vld [vmem:[%s146_s0 + $0xc] sm:$0xf]  ;;  %v87_v5 = vld [vmem:[%s146_s0 + $0x8] sm:$0xf] }
   0x4   :  { %23 = vst [vmem:[#allocation0 + $0x20] sm:$0xf] %v85_v3  ;;  %28 = vst [vmem:[#allocation0 + $0x18] sm:$0xf] %v86_v4  ;;  %v88_v6 = vld [vmem:[%s146_s0 + $0x4] sm:$0xf] }
   0x5   :  { %33 = vst [vmem:[#allocation0 + $0x10] sm:$0xf] %v87_v5  ;;  %v38_v7 = vld [vmem:[%s146_s0] sm:$0xf]  ;;  %37 = vst [vmem:[#allocation0 + $0x8] sm:$0xf] %v88_v6 }
   0x6   :  { %39 = vst [vmem:[#allocation0] sm:$0xf] %v38_v7  ;;  %s92_s0 = smov 24   ;;  %vm74_vm4 = vcmask 130112  }
   0xb   :  { %v49_v8 = vld [vmem:[#allocation0 + $0x3] ss:$8 sm:$0xf0]   ;;  %v59_v9 = vld [vmem:[#allocation0 + $0x2] ss:$8 sm:$0xf0]  }
   0xc   :  { %v69_v14 = vld [vmem:[#allocation0 + $0x1] ss:$8 sm:$0xf0]   ;;  %v41_v17 = vld [vmem:[#allocation0] ss:$8 sm:$0xf0]  }
   0xd   :  { %v47_v10 = vld [vmem:[#allocation0 + $0x3] ss:$8 sm:$0xf]   ;;  %v57_v11 = vld [vmem:[#allocation0 + $0x2] ss:$8 sm:$0xf]  }
   0xe   :  { %v51_v12 = vsel %vm42_vm0, %v49_v8, %v47_v10  ;;  %v67_v13 = vld [vmem:[#allocation0 + $0x1] ss:$8 sm:$0xf]   ;;  %v40_v16 = vld [vmem:[#allocation0] ss:$8 sm:$0xf]   ;;  %v61_v18 = vsel %vm42_vm0, %v59_v9, %v57_v11 }
   0xf   :  { %52 = vrot.lane.b32.xlu0 %v51_v12, %s92_s0  ;;  %v71_v15 = vsel %vm42_vm0, %v69_v14, %v67_v13  ;;  %v43_v19 = vsel %vm42_vm0, %v41_v17, %v40_v16 }
  0x10   :  { %72 = vrot.lane.b32.xlu1 %v71_v15, %s93_s22  ;;  %45 = vst.msk [vmem:[%s147_s1] sm:$0xff] %vm44_vm1, %v43_v19  }
  0x13   :  { %62 = vrot.lane.b32.xlu0 %v61_v18, %s94_s25 }
  0x81   :  { %v53_v20 = vpop.permute.xlu0 %52  }
  0x82   :  { %55 = vst.msk [vmem:[%s147_s1] sm:$0xff] %vm54_vm2, %v53_v20   ;;  %v73_v21 = vpop.permute.xlu1 %72  }
  0x85   :  { %v63_v22 = vpop.permute.xlu0 %62  }
  0x86   :  { %65 = vst.msk [vmem:[%s147_s1] sm:$0xff] %vm64_vm3, %v63_v22  }
  0x87   :  { %75 = vst.msk [vmem:[%s147_s1] sm:$0xff] %vm74_vm4, %v73_v21  }

// kernel: forward.1
= control target key start
LH: loop header
LB: loop body
LE: loop exit
PB: predicated region body
PF: predicated region fallthrough
CT: control target
= control target key end

     0   :  { %s3108_s21 = smov 0   ;;  %s3585_s0 = inlined_call_operand.vmem [shape: s32[16,1], index: 0, kind: input, shape index: {}]   ;;  %s3586_s1 = inlined_call_operand.vmem [shape: bf16[64,32], index: 1, kind: input, shape index: {}]   ;;  %s3587_s2 = inlined_call_operand.vmem [shape: f32[8,32], index: 2, kind: input, shape index: {}]   ;;  %s3588_s3 = inlined_call_operand.vmem [shape: f32[8,32], index: 3, kind: input, shape index: {}]   ;;  %s3589_s4 = inlined_call_operand.vmem [shape: f32[2,1,32], index: 4, kind: input, shape index: {}]   ;;  %s3590_s5 = inlined_call_operand.vmem [shape: bf16[2,32,640], index: 5, kind: input, shape index: {}]   ;;  %s3591_s6 = inlined_call_operand.vmem [shape: bf16[2,32,32], index: 6, kind: input, shape index: {}]   ;;  %s3592_s7 = inlined_call_operand.vmem [shape: f32[2,1,32], index: 7, kind: input, shape index: {}]   ;;  %s3593_s8 = inlined_call_operand.vmem [shape: bf16[2,32,256], index: 8, kind: input, shape index: {}]   ;;  %s3594_s9 = inlined_call_operand.vmem [shape: bf16[2,128,32], index: 9, kind: input, shape index: {}]   ;;  %s3595_s10 = inlined_call_operand.vmem [shape: f32[1,32], index: 10, kind: input, shape index: {}]   ;;  %s3596_s11 = inlined_call_operand.vmem [shape: bf16[32,128], index: 11, kind: input, shape index: {}]   ;;  %s3597_s12 = inlined_call_operand.vmem [shape: f32[16,128], index: 12, kind: output, shape index: {}]  }
   0x1 LB: > { %s2499_s22 = sadd.s32 4294967295, %s3032_s21   ;;  %p2503_p0 = scmp.ge.s32.totalorder %s3032_s21, 1  ;;  %s3032_s21 = sphi %s3108_s21, %s22_s21  }
   0x2   : > { %p361_p1 = scmp.lt.s32.totalorder %s3032_s21, 3 }
   0x4   : > { %p362_p2 = pnand %p2503_p0, %p361_p1 }
   0x5   : > { %p401_p3 = scmp.lt.s32.totalorder (!%p362_p2), %s2499_s22, 1  ;;  %v2910_v0 = vld [vmem:[%s3586_s1] sm:$0xff] (!%p362_p2)   ;;  %v3034_v1 = vmov (!%p362_p2), 0   ;;  %v3035_v2 = vmov (!%p362_p2), 0.0   ;;  %v2911_v3 = vld [vmem:[%s3586_s1 + $0x8] sm:$0xff] (!%p362_p2)   ;;  %v2912_v5 = vld [vmem:[%s3586_s1 + $0x10] sm:$0xff] (!%p362_p2)   ;;  %v411_v7 = vlaneseq (!%p362_p2) }
   0x6   : > { %365 = sbr.rel (%p362_p2) target bundleno = 5205 (0x1455), region = 68  ;;  %2909 = vset.pattern.permute.xlu0 (!%p362_p2), %v3034_v1  ;;  %2704 = vmatprep.subr.bf16.mxu1 (!%p362_p2), %v3035_v2  ;;  %v2913_v6 = vld [vmem:[%s3586_s1 + $0x18] sm:$0xff] (!%p362_p2)   ;;  %vm3036_vm0 = vmmov (!%p362_p2), 0   ;;  %vm452_vm2 = vcmask (!%p362_p2), 523264   ;;  %vm503_vm3 = vcmask (!%p362_p2), 261120   ;;  %v3205_v36 = vld [vmem:[%s3588_s3] sm:$0xff] (!%p362_p2) }
   0x7   : > { %2705 = vmatpush3.bf16.msra.mxu1 (!%p362_p2), %v2910_v0  ;;  %2716 = vmatprep.subr.bf16.mxu0 (!%p362_p2), %v3035_v2  ;;  %v3147_v8 = vand.u32 (!%p362_p2), 127, %v411_v7  ;;  %v2916_v18 = vld [vmem:[%s3590_s5 + $0x4] ss:$20 sps:$4 sm:$0xff] (!%p362_p2)   ;;  %v2914_v19 = vld [vmem:[%s3590_s5] ss:$20 sps:$4 sm:$0xff] (!%p362_p2)   ;;  %vm717_vm4 = vcmask (!%p362_p2), 64512  }
   0x8   : > { %2706 = vmatprep.subr.bf16.mxu1 (!%p362_p2), %v3035_v2  ;;  %2712 = vmatprep.mubr.msk.bf16.mxu1 (!%p362_p2), %vm3036_vm0, %v3035_v2  ;;  %v2917_v20 = vld [vmem:[%s3590_s5 + $0x10] ss:$20 sps:$4 sm:$0xff] (!%p362_p2)   ;;  %v2918_v21 = vld [vmem:[%s3590_s5 + $0x28] ss:$20 sps:$4 sm:$0xff] (!%p362_p2)   ;;  %v2920_v22 = vld [vmem:[%s3590_s5 + $0x2c] ss:$20 sps:$4 sm:$0xff] (!%p362_p2)  }
   0x9   : > { %2720 = vmatprep.mubr.msk.bf16.mxu0 (!%p362_p2), %vm3036_vm0, %v3035_v2  ;;  %2717 = vmatpush3.bf16.msra.mxu0 (!%p362_p2), %v2917_v20  ;;  %v2921_v23 = vld [vmem:[%s3590_s5 + $0x38] ss:$20 sps:$4 sm:$0xff] (!%p362_p2)   ;;  %v2512_v29 = vld [vmem:[%s3589_s4] ss:$0 sm:$0xff] (!%p362_p2)  ;;  %v2922_v32 = vld [vmem:[%s3590_s5 + $0x8] ss:$20 sps:$4 sm:$0xff] (!%p362_p2)  }
   0xa   : > { %2718 = vmatprep.subr.bf16.mxu0 (!%p362_p2), %v3035_v2  ;;  %v2924_v24 = vld [vmem:[%s3590_s5 + $0xc] ss:$20 sps:$4 sm:$0xff] (!%p362_p2)   ;;  %v2927_v34 = vld [vmem:[%s3590_s5 + $0x34] ss:$20 sps:$4 sm:$0xff] (!%p362_p2)   ;;  %v2925_v35 = vld [vmem:[%s3590_s5 + $0x30] ss:$20 sps:$4 sm:$0xff] (!%p362_p2)  }
   0xb   : > { %2707 = vmatpush3.bf16.msra.mxu1 (!%p362_p2), %v2911_v3  ;;  %v3210_v37 = vld [vmem:[%s3587_s2] sm:$0xff] (!%p362_p2)  ;;  %s3037_s13 = smov (!%p362_p2), 120   ;;  %vm781_vm5 = vcmask (!%p362_p2), 1043456   ;;  %s3038_s14 = smov (!%p362_p2), 112   ;;  %vm1174_vm7 = vcmask (!%p362_p2), 130048   ;;  %vm1176_vm8 = vcmask (!%p362_p2), 195584  }
   0xc   : > { %2708 = vmatprep.subr.bf16.mxu1 (!%p362_p2), %v3035_v2  ;;  %s3039_s15 = smov (!%p362_p2), 104   ;;  %s3040_s18 = smov (!%p362_p2), 8  }
   0xd   : > { %s3603_s22 = smov (!%p401_p3, %s2499_s22), 1  ;;  %2719 = vmatpush3.bf16.msra.mxu0 %v2921_v23  ;;  %s3041_s23 = smov 16  }
   0xe   : > { %s3598_s27 = sshll.u32 %s3603_s22, 3  ;;  %2730 = vmatprep.subr.bf16.mxu0 %v3035_v2  ;;  %s3042_s24 = smov 24  }
   0xf   : > { %s404_s30 = scalar_lea.vmem %s3585_s0, %s3598_s27  ;;  %2709 = vmatpush3.bf16.msra.mxu1 %v2912_v5 }
  0x10   : > { %v410_v4 = vld [vmem:[%s404_s30] sm:$0xff]  ;;  %2710 = vmatprep.subr.bf16.mxu1 %v3035_v2 }
  0x11   : > { %414 = vperm.xlu0 %2909, %v410_v4  }
  0x13   : > { %2711 = vmatpush3.bf16.msra.mxu1 %v2913_v6 }
  0x14   : > { %587 = vmatprep.subr.bf16.mxu1 %v2916_v18 }
  0x90   : > { %v415_v9 = vpop.permute.xlu0 %414 }
  0x91   : > { %vm416_vm1 = vcmp.eq.s32.totalorder %v3147_v8, %v415_v9 }
  0x92   : > { %v2506_v10 = vsel %vm416_vm1, 1.0, %v3035_v2 }
  0x93   : > { %v419_v11 = vpack.c.bf16 %v2506_v10, %v2506_v10  ;;  %v499_v10 = vshrl.u32 %v411_v7, 7 }
  0x95   : > { %2713 = vmatmul.mubr.msk.bf16.vlgmr.msra.gmra.mrb[0].mxu1 %vm452_vm2, %v419_v11  ;;  %vm3249_vm6 = vcmp.le.s32.totalorder %v3147_v8, %v499_v10 }
  0x96   : > { %619 = vmatprep.mubr.bf16.mxu1 %v3034_v1  ;;  %588 = vmatpush1.bf16.msra.mxu1 %v2914_v19 }
  0x97   : > { %589 = vmatprep.subr.bf16.mxu1 %v2920_v22 }
  0x9a   : > { %590 = vmatpush1.bf16.msra.mxu1 %v2918_v21 }
  0x9b   : > { %628 = vmatprep.subr.bf16.mxu1 %v2924_v24 }
 0x168   : > { %v3152_v12 = vpop.f32.mrb[0].mxu1 }
 0x169   : > { %v2714_v13 = vpop.f32.mrb[1].mxu1  ;;  %v502_v14 = vmul.f32 %v3152_v12, %v3152_v12 }
 0x16a   : > { %v493_v15 = vpop.f32.mrb[2].mxu1 }
 0x16b   : > { %v2715_v16 = vpop.f32.mrb[3].mxu1  ;;  %v504_v17 = vsel %vm503_vm3, %v502_v14, 0.0 }
 0x16c   : > { %505 = vadd.xlane.f32.xlu0 %v504_v17 }
 0x1f9   : > { %v506_v25 = vpop.xlane.xlu0 %505 }
 0x1fa   : > { %v508_v26 = vmul.f32 0.03125, %v506_v25 }
 0x1fc   : > { %v509_v27 = vadd.f32 1e-06, %v508_v26 }
 0x1fe   : > { %2976 = vrsqrt.f32 %v509_v27 }
 0x208   : > { %v2977_v28 = vpop.eup %2976 }
 0x209   : > { %v511_v30 = vmul.f32 %v2977_v28, %v3152_v12 }
 0x20b   : > { %v518_v31 = vmul.f32 %v2512_v29, %v511_v30 }
 0x20d   : > { %v531_v33 = vpack.c.bf16 %v518_v31, %v518_v31 }
 0x20f   : > { %2523 = vmatmul.mubr.msk.bf16.vlgmr.msra.gmra.mrb[4].mxu1 %vm503_vm3, %v531_v33  ;;  %2721 = vmatmul.mubr.msk.bf16.vlgmr.msra.gmra.mrb[0].mxu0 %vm503_vm3, %v531_v33 }
 0x210   : > { %629 = vmatpush1.bf16.msra.mxu1 %v2922_v32  ;;  %660 = vmatprep.mubr.bf16.mxu1 %v3034_v1 }
 0x211   : > { %630 = vmatprep.subr.bf16.mxu1 %v2927_v34  ;;  %2732 = vmatprep.mubr.msk.bf16.mxu0 %vm3036_vm0, %v3035_v2 }
 0x214   : > { %631 = vmatpush1.bf16.msra.mxu1 %v2925_v35 }
 0x215   : > { %2724 = vmatprep.subr.bf16.mxu1 %v3035_v2 }
 0x217   : > { %2524 = vmatmul.mubr.msk.bf16.vlgmr.msra.gmra.mrb[8].mxu1 %vm503_vm3, %v531_v33 }
 0x218   : > { %2726 = vmatprep.mubr.msk.bf16.mxu1 %vm3036_vm0, %v3035_v2 }
 0x2e2   : > { %v621_v38 = vpop.f32.mrb[4].mxu1  ;;  %v703_v39 = vpop.f32.mrb[0].mxu0 }
 0x2e3   : > { %v713_v40 = vmul.f32 %v703_v39, %v3205_v36  ;;  %v623_v41 = vpop.f32.mrb[5].mxu1  ;;  %v2722_v42 = vpop.f32.mrb[1].mxu0  ;;  %v709_v54 = vmul.f32 %v621_v38, %v3210_v37 }
 0x2e4   : > { %v712_v43 = vmul.f32 %v623_v41, %v3210_v37  ;;  %v625_v44 = vpop.f32.mrb[6].mxu1  ;;  %v706_v45 = vpop.f32.mrb[2].mxu0 }
 0x2e5   : > { %v626_v46 = vpop.f32.mrb[7].mxu1  ;;  %v2723_v47 = vpop.f32.mrb[3].mxu0 }
 0x2e6   : > { %v714_v48 = vadd.f32 %v713_v40, %v712_v43 }
 0x2e8   : > { %v716_v49 = vpack.c.bf16 %v714_v48, %v714_v48 }
 0x2ea   : > { %829 = vrot.lane.b32.xlu1 %v716_v49, %s3037_s13  ;;  %v662_v50 = vpop.f32.mrb[8].mxu1  ;;  %v722_v51 = vsel %vm717_vm4, %v716_v49, 0 }
 0x2eb   : > { %v3216_v52 = vpack.c.bf16 %v662_v50, %v662_v50  ;;  %v664_v53 = vpop.f32.mrb[9].mxu1  ;;  %2725 = vmatpush3.bf16.xpose.msra.mxu1 %v722_v51 }
 0x2ec   : > { %v710_v55 = vmul.f32 %v664_v53, %v3205_v36  ;;  %v666_v56 = vpop.f32.mrb[10].mxu1  ;;  %2736 = vmatprep.subr.bf16.mxu1 %v3035_v2 }
 0x2ed   : > { %v667_v57 = vpop.f32.mrb[11].mxu1  ;;  %v783_v58 = vsel %vm781_vm5, %v3216_v52, 0 }
 0x2ee   : > { %v711_v59 = vadd.f32 %v710_v55, %v709_v54  ;;  %941 = vrot.lane.b32.xlu1 %v716_v49, %s3038_s14  ;;  %2731 = vmatpush3.bf16.msra.mxu0 %v783_v58 }
 0x2ef   : > { %2742 = vmatprep.subr.bf16.mxu0 %v3035_v2 }
 0x2f0   : > { %v715_v60 = vpack.c.bf16 %v711_v59, %v711_v59 }
 0x2f2   : > { %826 = vrot.lane.b32.xlu1 %v715_v60, %s3037_s13  ;;  %2727 = vmatmul.mubr.msk.bf16.vlgmr.msra.gmra.mrb[12].mxu1 %vm717_vm4, %v715_v60 }
 0x2f3   : > { %2738 = vmatprep.mubr.msk.bf16.mxu1 %vm3036_vm0, %v3035_v2 }
 0x2f6   : > { %939 = vrot.lane.b32.xlu1 %v715_v60, %s3038_s14 }
 0x2fa   : > { %1052 = vrot.lane.b32.xlu1 %v716_v49, %s3039_s15 }
 0x2fe   : > { %1050 = vrot.lane.b32.xlu1 %v715_v60, %s3039_s15 }
 0x35c   : > { %v830_v61 = vpop.permute.xlu1 %829 }
 0x35d   : > { %v835_v62 = vsel %vm717_vm4, %v830_v61, 0 }
 0x35e   : > { %2737 = vmatpush3.bf16.xpose.msra.mxu1 %v835_v62 }
 0x35f   : > { %2748 = vmatprep.subr.bf16.mxu1 %v3035_v2 }
 0x360   : > { %v942_v63 = vpop.permute.xlu1 %941 }
 0x361   : > { %v947_v3 = vsel %vm717_vm4, %v942_v63, 0 }
 0x364   : > { %v827_v0 = vpop.permute.xlu1 %826 }
 0x365   : > { %2739 = vmatmul.mubr.msk.bf16.vlgmr.msra.gmra.mrb[16].mxu1 %vm717_vm4, %v827_v0 }
 0x366   : > { %2749 = vmatpush3.bf16.xpose.msra.mxu1 %v947_v3  ;;  %2750 = vmatprep.mubr.msk.bf16.mxu1 %vm3036_vm0, %v3035_v2 }
 0x367   : > { %2760 = vmatprep.subr.bf16.mxu1 %v3035_v2 }
 0x368   : > { %v940_v4 = vpop.permute.xlu1 %939 }
 0x36c   : > { %v1053_v5 = vpop.permute.xlu1 %1052 }
 0x36d   : > { %v1058_v6 = vsel %vm717_vm4, %v1053_v5, 0  ;;  %2751 = vmatmul.mubr.msk.bf16.vlgmr.msra.gmra.mrb[20].mxu1 %vm717_vm4, %v940_v4 }
 0x36e   : > { %2761 = vmatpush3.bf16.xpose.msra.mxu1 %v1058_v6  ;;  %2762 = vmatprep.mubr.msk.bf16.mxu1 %vm3036_vm0, %v3035_v2 }
 0x36f   : > { %2772 = vmatprep.subr.bf16.mxu1 %v3035_v2 }
 0x370   : > { %v1051_v9 = vpop.permute.xlu1 %1050 }
 0x375   : > { %2763 = vmatmul.mubr.msk.bf16.vlgmr.msra.gmra.mrb[24].mxu1 %vm717_vm4, %v1051_v9 }
 0x376   : > { %2776 = vmatprep.mubr.msk.bf16.mxu1 %vm3036_vm0, %v3035_v2 }
 0x3c5   : > { %v758_v13 = vpop.f32.mrb[12].mxu1 }
 0x3c6   : > { %v764_v14 = vsel %vm3249_vm6, %v758_v13, -1e+30  ;;  %v2728_v15 = vpop.f32.mrb[13].mxu1 }
 0x3c7   : > { %v761_v16 = vpop.f32.mrb[14].mxu1  ;;  %v765_v17 = vsel %vm717_vm4, %v764_v14, -inf }
 0x3c8   : > { %766 = vmax.xlane.f32.xlu1 %v765_v17  ;;  %v2729_v18 = vpop.f32.mrb[15].mxu1 }
 0x3d9   : > { %891 = vrot.lane.b32.xlu1 %v3216_v52, %s3037_s13 }
 0x3dd   : > { %1113 = vrot.lane.b32.xlu1 %v3216_v52, %s3039_s15 }
 0x438   : > { %v871_v7 = vpop.f32.mrb[16].mxu1 }
 0x439   : > { %v877_v8 = vsel %vm3249_vm6, %v871_v7, -1e+30  ;;  %v2740_v19 = vpop.f32.mrb[17].mxu1 }
 0x43a   : > { %v874_v20 = vpop.f32.mrb[18].mxu1  ;;  %v878_v21 = vsel %vm717_vm4, %v877_v8, -inf }
 0x43b   : > { %879 = vmax.xlane.f32.xlu0 %v878_v21  ;;  %v2741_v22 = vpop.f32.mrb[19].mxu1 }
 0x440   : > { %v983_v23 = vpop.f32.mrb[20].mxu1 }
 0x441   : > { %v989_v24 = vsel %vm3249_vm6, %v983_v23, -1e+30  ;;  %v2752_v25 = vpop.f32.mrb[21].mxu1  ;;  %v2928_v23 = vld [vmem:[%s3591_s6] sm:$0xff]  }
 0x442   : > { %v986_v26 = vpop.f32.mrb[22].mxu1  ;;  %v990_v27 = vsel %vm717_vm4, %v989_v24, -inf  ;;  %2773 = vmatpush3.bf16.msra.mxu1 %v2928_v23 }
 0x443   : > { %991 = vmax.xlane.f32.xlu0 %v990_v27  ;;  %v2753_v28 = vpop.f32.mrb[23].mxu1  ;;  %2774 = vmatprep.subr.bf16.mxu1 %v3035_v2 }
 0x444   : > { %v2929_v28 = vld [vmem:[%s3591_s6 + $0x8] sm:$0xff]  }
 0x446   : > { %2775 = vmatpush3.bf16.msra.mxu1 %v2929_v28 }
 0x447   : > { %2780 = vmatprep.subr.bf16.mxu1 %v3035_v2 }
 0x448   : > { %v1094_v29 = vpop.f32.mrb[24].mxu1 }
 0x449   : > { %v1100_v30 = vsel %vm3249_vm6, %v1094_v29, -1e+30  ;;  %v2764_v31 = vpop.f32.mrb[25].mxu1 }
 0x44a   : > { %v1097_v32 = vpop.f32.mrb[26].mxu1  ;;  %v1101_v33 = vsel %vm717_vm4, %v1100_v30, -inf }
 0x44b   : > { %1102 = vmax.xlane.f32.xlu0 %v1101_v33  ;;  %v2765_v34 = vpop.f32.mrb[27].mxu1 }
 0x455   : > { %v767_v35 = vpop.xlane.xlu1 %766 }
 0x456   : > { %v768_v38 = vsub.f32 %v764_v14, %v767_v35 }
 0x458   : > { %v769_v39 = vmul.f32 1.442695, %v768_v38 }
 0x459   : > { %v892_v61 = vpop.permute.xlu1 %891 }
 0x45a   : > { %2978 = vpow2.f32 %v769_v39  ;;  %v897_v63 = vsel %vm781_vm5, %v892_v61, 0  ;;  %v2537_v61 = vld [vmem:[%s3592_s7] ss:$0 sm:$0xff] }
 0x45d   : > { %v1114_v15 = vpop.permute.xlu1 %1113 }
 0x45e   : > { %v1119_v17 = vsel %vm781_vm5, %v1114_v15, 0 }
 0x464   : > { %v2979_v40 = vpop.eup %2978 }
 0x465   : > { %v771_v41 = vsel %vm717_vm4, %v2979_v40, 0.0 }
 0x466   : > { %772 = vadd.xlane.f32.xlu0 %v771_v41 }
 0x4c8   : > { %v880_v42 = vpop.xlane.xlu0 %879 }
 0x4c9   : > { %v881_v43 = vsub.f32 %v877_v8, %v880_v42 }
 0x4cb   : > { %v882_v44 = vmul.f32 1.442695, %v881_v43 }
 0x4cd   : > { %2980 = vpow2.f32 %v882_v44 }
 0x4d0   : > { %v992_v45 = vpop.xlane.xlu0 %991 }
 0x4d1   : > { %v993_v46 = vsub.f32 %v989_v24, %v992_v45 }
 0x4d3   : > { %v994_v47 = vmul.f32 1.442695, %v993_v46 }
 0x4d5   : > { %2982 = vpow2.f32 %v994_v47 }
 0x4d7   : > { %v2981_v48 = vpop.eup %2980 }
 0x4d8   : > { %v1103_v49 = vpop.xlane.xlu0 %1102  ;;  %v884_v50 = vsel %vm717_vm4, %v2981_v48, 0.0 }
 0x4d9   : > { %v1104_v51 = vsub.f32 %v1100_v30, %v1103_v49  ;;  %885 = vadd.xlane.f32.xlu0 %v884_v50 }
 0x4db   : > { %v1105_v53 = vmul.f32 1.442695, %v1104_v51 }
 0x4dd   : > { %2984 = vpow2.f32 %v1105_v53 }
 0x4df   : > { %v2983_v54 = vpop.eup %2982 }
 0x4e0   : > { %v996_v55 = vsel %vm717_vm4, %v2983_v54, 0.0 }
 0x4e1   : > { %997 = vadd.xlane.f32.xlu0 %v996_v55  ;;  %v2930_v55 = vld [vmem:[%s3593_s8] ss:$8 sps:$4 sm:$0xff]  }
 0x4e7   : > { %v2985_v56 = vpop.eup %2984 }
 0x4e8   : > { %v1107_v57 = vsel %vm717_vm4, %v2985_v56, 0.0 }
 0x4e9   : > { %1108 = vadd.xlane.f32.xlu0 %v1107_v57 }
 0x4f3   : > { %v773_v58 = vpop.xlane.xlu0 %772 }
 0x4f4   : > { %2986 = vrcp.f32 %v773_v58 }
 0x4fe   : > { %v2987_v59 = vpop.eup %2986 }
 0x4ff   : > { %v775_v60 = vmul.f32 %v2987_v59, %v2979_v40  ;;  %1002 = vrot.lane.b32.xlu0 %v3216_v52, %s3038_s14 }
 0x501   : > { %v776_v62 = vpack.c.bf16 %v775_v60, %v775_v60 }
 0x503   : > { %2733 = vmatmul.mubr.msk.bf16.vlgmr.msra.gmra.mrb[4].mxu0 %vm717_vm4, %v776_v62 }
 0x504   : > { %2743 = vmatpush3.bf16.msra.mxu0 %v897_v63  ;;  %2744 = vmatprep.mubr.msk.bf16.mxu0 %vm3036_vm0, %v3035_v2 }
 0x505   : > { %2754 = vmatprep.subr.bf16.mxu0 %v3035_v2 }
 0x566   : > { %v886_v0 = vpop.xlane.xlu0 %885 }
 0x567   : > { %2988 = vrcp.f32 %v886_v0 }
 0x56e   : > { %v998_v3 = vpop.xlane.xlu0 %997 }
 0x56f   : > { %2990 = vrcp.f32 %v998_v3  ;;  %v2936_v3 = vld [vmem:[%s3594_s9] sm:$0xff]  }
 0x571   : > { %v2989_v4 = vpop.eup %2988 }
 0x572   : > { %v888_v5 = vmul.f32 %v2989_v4, %v2981_v48  ;;  %v2937_v4 = vld [vmem:[%s3594_s9 + $0x8] sm:$0xff]  }
 0x574   : > { %v889_v6 = vpack.c.bf16 %v888_v5, %v888_v5  ;;  %v2938_v5 = vld [vmem:[%s3594_s9 + $0x10] sm:$0xff]  }
 0x576   : > { %2745 = vmatmul.mubr.msk.bf16.vlgmr.msra.gmra.mrb[8].mxu0 %vm717_vm4, %v889_v6  ;;  %v1109_v52 = vpop.xlane.xlu0 %1108  ;;  %v2939_v6 = vld [vmem:[%s3594_s9 + $0x18] sm:$0xff]  }
 0x577   : > { %2992 = vrcp.f32 %v1109_v52  ;;  %2756 = vmatprep.mubr.msk.bf16.mxu0 %vm3036_vm0, %v3035_v2  ;;  %v2940_v52 = vld [vmem:[%s3594_s9 + $0x20] sm:$0xff]  }
 0x579   : > { %v2991_v9 = vpop.eup %2990 }
 0x57a   : > { %v1000_v10 = vmul.f32 %v2991_v9, %v2983_v54  ;;  %v1003_v13 = vpop.permute.xlu0 %1002  ;;  %v2932_v54 = vld [vmem:[%s3593_s8 + $0x4] ss:$8 sps:$4 sm:$0xff]  }
 0x57b   : > { %v1008_v14 = vsel %vm781_vm5, %v1003_v13, 0  ;;  %v2941_v9 = vld [vmem:[%s3594_s9 + $0x28] sm:$0xff]   ;;  %v2943_v13 = vld [vmem:[%s3594_s9 + $0x38] sm:$0xff]  }
 0x57c   : > { %2755 = vmatpush3.bf16.msra.mxu0 %v1008_v14  ;;  %v1001_v16 = vpack.c.bf16 %v1000_v10, %v1000_v10  ;;  %v2942_v10 = vld [vmem:[%s3594_s9 + $0x30] sm:$0xff]  }
 0x57d   : > { %2766 = vmatprep.subr.bf16.mxu0 %v3035_v2 }
 0x57f   : > { %2757 = vmatmul.mubr.msk.bf16.vlgmr.msra.gmra.mrb[12].mxu0 %vm717_vm4, %v1001_v16 }
 0x580   : > { %2767 = vmatpush3.bf16.msra.mxu0 %v1119_v17  ;;  %2768 = vmatprep.mubr.msk.bf16.mxu0 %vm3036_vm0, %v3035_v2 }
 0x581   : > { %v2993_v18 = vpop.eup %2992  ;;  %1282 = vmatprep.subr.bf16.mxu0 %v2932_v54 }
 0x582   : > { %v1111_v7 = vmul.f32 %v2993_v18, %v2985_v56  ;;  %v2935_v56 = vld [vmem:[%s3593_s8 + $0x14] ss:$8 sps:$4 sm:$0xff]  }
 0x584   : > { %v1112_v8 = vpack.c.bf16 %v1111_v7, %v1111_v7 }
 0x587   : > { %2769 = vmatmul.mubr.msk.bf16.vlgmr.msra.gmra.mrb[16].mxu0 %vm717_vm4, %v1112_v8 }
 0x588   : > { %1314 = vmatprep.mubr.bf16.mxu0 %v3034_v1  ;;  %1283 = vmatpush1.bf16.msra.mxu0 %v2930_v55 }
 0x589   : > { %1284 = vmatprep.subr.bf16.mxu0 %v2935_v56 }
 0x5d6   : > { %v819_v19 = vpop.f32.mrb[4].mxu0 }
 0x5d7   : > { %v2734_v20 = vpop.f32.mrb[5].mxu0 }
 0x5d8   : > { %v822_v21 = vpop.f32.mrb[6].mxu0 }
 0x5d9   : > { %v2735_v22 = vpop.f32.mrb[7].mxu0 }
 0x649   : > { %v933_v24 = vpop.f32.mrb[8].mxu0 }
 0x64a   : > { %1162 = vrot.lane.b32.xlu1 %v933_v24, %s3040_s18  ;;  %v2746_v25 = vpop.f32.mrb[9].mxu0 }
 0x64b   : > { %v936_v26 = vpop.f32.mrb[10].mxu0 }
 0x64c   : > { %v2747_v27 = vpop.f32.mrb[11].mxu0 }
 0x652   : > { %v1044_v29 = vpop.f32.mrb[12].mxu0 }
 0x653   : > { %1166 = vrot.lane.b32.xlu0 %v1044_v29, %s3041_s23  ;;  %v2758_v30 = vpop.f32.mrb[13].mxu0 }
 0x654   : > { %v1047_v31 = vpop.f32.mrb[14].mxu0 }
 0x655   : > { %v2759_v32 = vpop.f32.mrb[15].mxu0  ;;  %v2946_v31 = vld [vmem:[%s3590_s5 + $0x54] ss:$20 sps:$4 sm:$0xff]  }
 0x656   : > { %v2944_v32 = vld [vmem:[%s3590_s5 + $0x50] ss:$20 sps:$4 sm:$0xff]  }
 0x65a   : > { %v1155_v33 = vpop.f32.mrb[16].mxu0 }
 0x65b   : > { %1170 = vrot.lane.b32.xlu1 %v1155_v33, %s3042_s24  ;;  %v2770_v34 = vpop.f32.mrb[17].mxu0  ;;  %v2947_v33 = vld [vmem:[%s3590_s5 + $0x78] ss:$20 sps:$4 sm:$0xff]  }
 0x65c   : > { %v1158_v35 = vpop.f32.mrb[18].mxu0  ;;  %v2949_v34 = vld [vmem:[%s3590_s5 + $0x7c] ss:$20 sps:$4 sm:$0xff]  }
 0x65d   : > { %v2771_v38 = vpop.f32.mrb[19].mxu0  ;;  %v2952_v35 = vld [vmem:[%s3590_s5 + $0x5c] ss:$20 sps:$4 sm:$0xff]  }
 0x6bc   : > { %v1163_v39 = vpop.permute.xlu1 %1162 }
 0x6bd   : > { %v1173_v41 = vsel %vm717_vm4, %v819_v19, %v1163_v39 }
 0x6c5   : > { %v1167_v40 = vpop.permute.xlu0 %1166 }
 0x6c6   : > { %v1175_v42 = vsel %vm1174_vm7, %v1173_v41, %v1167_v40 }
 0x6cd   : > { %v1171_v43 = vpop.permute.xlu1 %1170 }
 0x6ce   : > { %v1177_v44 = vsel %vm1176_vm8, %v1175_v42, %v1171_v43  ;;  %v2552_v42 = vld [vmem:[%s3589_s4 + $0x1] ss:$0 sm:$0xff] }
 0x6cf   : > { %v1182_v45 = vpack.c.bf16 %v1177_v44, %v1177_v44 }
 0x6d1   : > { %2777 = vmatmul.mubr.msk.bf16.vlgmr.msra.gmra.mrb[28].mxu1 %vm503_vm3, %v1182_v45  ;;  %v2950_v45 = vld [vmem:[%s3590_s5 + $0x58] ss:$20 sps:$4 sm:$0xff]  }
 0x6d2   : > { %2796 = vmatprep.mubr.msk.bf16.mxu1 %vm3036_vm0, %v3035_v2  ;;  %2781 = vmatpush3.bf16.msra.mxu1 %v2936_v3 }
 0x6d3   : > { %2782 = vmatprep.subr.bf16.mxu1 %v3035_v2 }
 0x6d6   : > { %2783 = vmatpush3.bf16.msra.mxu1 %v2937_v4 }
 0x6d7   : > { %2784 = vmatprep.subr.bf16.mxu1 %v3035_v2 }
 0x6da   : > { %2785 = vmatpush3.bf16.msra.mxu1 %v2938_v5 }
 0x6db   : > { %2786 = vmatprep.subr.bf16.mxu1 %v3035_v2 }
 0x6de   : > { %2787 = vmatpush3.bf16.msra.mxu1 %v2939_v6 }
 0x6df   : > { %2788 = vmatprep.subr.bf16.mxu1 %v3035_v2 }
 0x6e2   : > { %2789 = vmatpush3.bf16.msra.mxu1 %v2940_v52 }
 0x6e3   : > { %2790 = vmatprep.subr.bf16.mxu1 %v3035_v2 }
 0x6e6   : > { %2791 = vmatpush3.bf16.msra.mxu1 %v2941_v9 }
 0x6e7   : > { %2792 = vmatprep.subr.bf16.mxu1 %v3035_v2 }
 0x6ea   : > { %2793 = vmatpush3.bf16.msra.mxu1 %v2942_v10 }
 0x6eb   : > { %2794 = vmatprep.subr.bf16.mxu1 %v3035_v2 }
 0x6ee   : > { %2795 = vmatpush3.bf16.msra.mxu1 %v2943_v13 }
 0x6ef   : > { %2814 = vmatprep.subr.bf16.mxu1 %v3035_v2 }
 0x7a4   : > { %v1232_v46 = vpop.f32.mrb[28].mxu1 }
 0x7a5   : > { %v3309_v47 = vadd.f32 %v1232_v46, %v3152_v12  ;;  %v2778_v48 = vpop.f32.mrb[29].mxu1  ;;  %v2933_v12 = vld [vmem:[%s3593_s8 + $0x10] ss:$8 sps:$4 sm:$0xff]  }
 0x7a6   : > { %v1235_v49 = vpop.f32.mrb[30].mxu1  ;;  %1285 = vmatpush1.bf16.msra.mxu0 %v2933_v12  ;;  %v2953_v48 = vld [vmem:[%s3590_s5 + $0x80] ss:$20 sps:$4 sm:$0xff]  }
 0x7a7   : > { %v2779_v50 = vpop.f32.mrb[31].mxu1  ;;  %v1239_v51 = vmul.f32 %v3309_v47, %v3309_v47  ;;  %1521 = vmatprep.subr.bf16.mxu0 %v2946_v31  ;;  %v2956_v49 = vld [vmem:[%s3590_s5 + $0x60] ss:$20 sps:$4 sm:$0xff]  }
 0x7a8   : > { %v2957_v50 = vld [vmem:[%s3590_s5 + $0x88] ss:$20 sps:$4 sm:$0xff]  }
 0x7a9   : > { %v1240_v53 = vsel %vm503_vm3, %v1239_v51, 0.0 }
 0x7aa   : > { %1241 = vadd.xlane.f32.xlu0 %v1240_v53 }
 0x837   : > { %v1242_v57 = vpop.xlane.xlu0 %1241 }
 0x838   : > { %v1243_v58 = vmul.f32 0.03125, %v1242_v57 }
 0x83a   : > { %v1244_v59 = vadd.f32 1e-06, %v1243_v58 }
 0x83c   : > { %2994 = vrsqrt.f32 %v1244_v59 }
 0x846   : > { %v2995_v60 = vpop.eup %2994 }
 0x847   : > { %v1246_v62 = vmul.f32 %v2995_v60, %v3309_v47 }
 0x849   : > { %v1253_v63 = vmul.f32 %v2537_v61, %v1246_v62 }
 0x84b   : > { %v1258_v0 = vpack.c.bf16 %v1253_v63, %v1253_v63 }
 0x84d   : > { %2542 = vmatmul.mubr.msk.bf16.vlgmr.msra.gmra.mrb[20].mxu0 %vm503_vm3, %v1258_v0 }
 0x84e   : > { %1553 = vmatprep.mubr.bf16.mxu0 %v3034_v1  ;;  %1522 = vmatpush1.bf16.msra.mxu0 %v2944_v32 }
 0x84f   : > { %1523 = vmatprep.subr.bf16.mxu0 %v2949_v34 }
 0x852   : > { %1524 = vmatpush1.bf16.msra.mxu0 %v2947_v33 }
 0x853   : > { %1562 = vmatprep.subr.bf16.mxu0 %v2952_v35 }
 0x920   : > { %v1316_v14 = vpop.f32.mrb[20].mxu0 }
 0x921   : > { %v1323_v15 = vsub.f32 0.0, %v1316_v14  ;;  %v1318_v16 = vpop.f32.mrb[21].mxu0 }
 0x922   : > { %v1320_v17 = vpop.f32.mrb[22].mxu0 }
 0x923   : > { %v1324_v18 = vmul.f32 1.442695, %v1323_v15  ;;  %v1321_v7 = vpop.f32.mrb[23].mxu0 }
 0x925   : > { %2996 = vpow2.f32 %v1324_v18 }
 0x92f   : > { %v2997_v8 = vpop.eup %2996 }
 0x930   : > { %v1326_v19 = vadd.f32 1.0, %v2997_v8 }
 0x932   : > { %2998 = vrcp.f32 %v1326_v19 }
 0x93c   : > { %v2999_v20 = vpop.eup %2998 }
 0x93d   : > { %v1328_v21 = vmul.f32 %v2999_v20, %v1316_v14 }
 0x93f   : > { %v1329_v22 = vmul.f32 %v1328_v21, %v1318_v16 }
 0x941   : > { %v1346_v23 = vpack.c.bf16 %v1329_v22, %v1329_v22 }
 0x943   : > { %2797 = vmatmul.mubr.bf16.vlgmr.msra.gmra.mrb[32].mxu1 %v1346_v23 }
 0x944   : > { %2816 = vmatprep.mubr.msk.bf16.mxu1 %vm3036_vm0, %v3035_v2 }
 0xa16   : > { %v1429_v24 = vpop.f32.mrb[32].mxu1 }
 0xa17   : > { %v3367_v25 = vadd.f32 %v1429_v24, %v3309_v47  ;;  %v2798_v26 = vpop.f32.mrb[33].mxu1  ;;  %v2955_v47 = vld [vmem:[%s3590_s5 + $0x84] ss:$20 sps:$4 sm:$0xff]  }
 0xa18   : > { %v1432_v27 = vpop.f32.mrb[34].mxu1 }
 0xa19   : > { %v2799_v28 = vpop.f32.mrb[35].mxu1  ;;  %v1437_v29 = vmul.f32 %v3367_v25, %v3367_v25 }
 0xa1b   : > { %v1438_v30 = vsel %vm503_vm3, %v1437_v29, 0.0 }
 0xa1c   : > { %1439 = vadd.xlane.f32.xlu1 %v1438_v30 }
 0xaa9   : > { %v1440_v38 = vpop.xlane.xlu1 %1439 }
 0xaaa   : > { %v1441_v39 = vmul.f32 0.03125, %v1440_v38 }
 0xaac   : > { %v1442_v40 = vadd.f32 1e-06, %v1441_v39 }
 0xaae   : > { %3000 = vrsqrt.f32 %v1442_v40 }
 0xab8   : > { %v3001_v41 = vpop.eup %3000 }
 0xab9   : > { %v1444_v43 = vmul.f32 %v3001_v41, %v3367_v25 }
 0xabb   : > { %v1451_v44 = vmul.f32 %v2552_v42, %v1444_v43 }
 0xabd   : > { %v1465_v46 = vpack.c.bf16 %v1451_v44, %v1451_v44 }
 0xabf   : > { %2575 = vmatmul.mubr.msk.bf16.vlgmr.msra.gmra.mrb[24].mxu0 %vm503_vm3, %v1465_v46 }
 0xac0   : > { %1563 = vmatpush1.bf16.msra.mxu0 %v2950_v45  ;;  %1594 = vmatprep.mubr.bf16.mxu0 %v3034_v1 }
 0xac1   : > { %1564 = vmatprep.subr.bf16.mxu0 %v2955_v47 }
 0xac4   : > { %1565 = vmatpush1.bf16.msra.mxu0 %v2953_v48 }
 0xac5   : > { %2800 = vmatprep.subr.bf16.mxu0 %v3035_v2 }
 0xac7   : > { %2576 = vmatmul.mubr.msk.bf16.vlgmr.msra.gmra.mrb[28].mxu0 %vm503_vm3, %v1465_v46 }
 0xac8   : > { %2801 = vmatpush3.bf16.msra.mxu0 %v2956_v49  ;;  %2804 = vmatprep.mubr.msk.bf16.mxu0 %vm3036_vm0, %v3035_v2 }
 0xac9   : > { %2802 = vmatprep.subr.bf16.mxu0 %v3035_v2 }
 0xacc   : > { %2803 = vmatpush3.bf16.msra.mxu0 %v2957_v50 }
 0xacd   : > { %2808 = vmatprep.subr.bf16.mxu0 %v3035_v2 }
 0xacf   : > { %2805 = vmatmul.mubr.msk.bf16.vlgmr.msra.gmra.mrb[32].mxu0 %vm503_vm3, %v1465_v46 }
 0xad0   : > { %2810 = vmatprep.mubr.msk.bf16.mxu0 %vm3036_vm0, %v3035_v2 }
 0xb92   : > { %v1555_v51 = vpop.f32.mrb[24].mxu0 }
 0xb93   : > { %v1557_v53 = vpop.f32.mrb[25].mxu0  ;;  %v1643_v58 = vmul.f32 %v1555_v51, %v3210_v37 }
 0xb94   : > { %v1559_v54 = vpop.f32.mrb[26].mxu0  ;;  %v1646_v4 = vmul.f32 %v1557_v53, %v3210_v37 }
 0xb95   : > { %v1560_v55 = vpop.f32.mrb[27].mxu0 }
 0xb9a   : > { %v1596_v12 = vpop.f32.mrb[28].mxu0 }
 0xb9b   : > { %v3417_v56 = vpack.c.bf16 %v1596_v12, %v1596_v12  ;;  %v1598_v57 = vpop.f32.mrb[29].mxu0 }
 0xb9c   : > { %v1644_v59 = vmul.f32 %v1598_v57, %v3205_v36  ;;  %v1600_v60 = vpop.f32.mrb[30].mxu0 }
 0xb9d   : > { %v1601_v61 = vpop.f32.mrb[31].mxu0  ;;  %v1715_v62 = vsel %vm781_vm5, %v3417_v56, 0 }
 0xb9e   : > { %v1645_v63 = vadd.f32 %v1644_v59, %v1643_v58  ;;  %2815 = vmatpush3.bf16.msra.mxu1 %v1715_v62 }
 0xb9f   : > { %2826 = vmatprep.subr.bf16.mxu1 %v3035_v2 }
 0xba0   : > { %v1649_v0 = vpack.c.bf16 %v1645_v63, %v1645_v63 }
 0xba2   : > { %1758 = vrot.lane.b32.xlu1 %v1649_v0, %s3037_s13  ;;  %v1637_v3 = vpop.f32.mrb[32].mxu0 }
 0xba3   : > { %v1647_v5 = vmul.f32 %v1637_v3, %v3205_v36  ;;  %v2806_v6 = vpop.f32.mrb[33].mxu0 }
 0xba4   : > { %v1640_v52 = vpop.f32.mrb[34].mxu0 }
 0xba5   : > { %v1648_v9 = vadd.f32 %v1647_v5, %v1646_v4  ;;  %v2807_v10 = vpop.f32.mrb[35].mxu0 }
 0xba6   : > { %1871 = vrot.lane.b32.xlu1 %v1649_v0, %s3038_s14 }
 0xba7   : > { %v1650_v13 = vpack.c.bf16 %v1648_v9, %v1648_v9 }
 0xba9   : > { %1761 = vrot.lane.b32.xlu0 %v1650_v13, %s3037_s13  ;;  %v1655_v14 = vsel %vm717_vm4, %v1650_v13, 0 }
 0xbaa   : > { %1982 = vrot.lane.b32.xlu1 %v1649_v0, %s3039_s15  ;;  %2809 = vmatpush3.bf16.xpose.msra.mxu0 %v1655_v14 }
 0xbab   : > { %2820 = vmatprep.subr.bf16.mxu0 %v3035_v2 }
 0xbad   : > { %1873 = vrot.lane.b32.xlu0 %v1650_v13, %s3038_s14 }
 0xbb1   : > { %1984 = vrot.lane.b32.xlu0 %v1650_v13, %s3039_s15  ;;  %2811 = vmatmul.mubr.msk.bf16.vlgmr.msra.gmra.mrb[36].mxu0 %vm717_vm4, %v1649_v0 }
 0xbb2   : > { %2822 = vmatprep.mubr.msk.bf16.mxu0 %vm3036_vm0, %v3035_v2 }
 0xc14   : > { %v1759_v16 = vpop.permute.xlu1 %1758 }
 0xc18   : > { %v1872_v7 = vpop.permute.xlu1 %1871 }
 0xc1b   : > { %v1762_v36 = vpop.permute.xlu0 %1761 }
 0xc1c   : > { %v1767_v37 = vsel %vm717_vm4, %v1762_v36, 0  ;;  %v1983_v19 = vpop.permute.xlu1 %1982 }
 0xc1d   : > { %2821 = vmatpush3.bf16.xpose.msra.mxu0 %v1767_v37 }
 0xc1e   : > { %2832 = vmatprep.subr.bf16.mxu0 %v3035_v2 }
 0xc1f   : > { %v1874_v15 = vpop.permute.xlu0 %1873 }
 0xc20   : > { %v1879_v17 = vsel %vm717_vm4, %v1874_v15, 0 }
 0xc23   : > { %v1985_v18 = vpop.permute.xlu0 %1984 }
 0xc24   : > { %2823 = vmatmul.mubr.msk.bf16.vlgmr.msra.gmra.mrb[40].mxu0 %vm717_vm4, %v1759_v16  ;;  %v1990_v8 = vsel %vm717_vm4, %v1985_v18, 0 }
 0xc25   : > { %2833 = vmatpush3.bf16.xpose.msra.mxu0 %v1879_v17  ;;  %2834 = vmatprep.mubr.msk.bf16.mxu0 %vm3036_vm0, %v3035_v2 }
 0xc26   : > { %2844 = vmatprep.subr.bf16.mxu0 %v3035_v2 }
 0xc2c   : > { %2835 = vmatmul.mubr.msk.bf16.vlgmr.msra.gmra.mrb[44].mxu0 %vm717_vm4, %v1872_v7 }
 0xc2d   : > { %2845 = vmatpush3.bf16.xpose.msra.mxu0 %v1990_v8  ;;  %2846 = vmatprep.mubr.msk.bf16.mxu0 %vm3036_vm0, %v3035_v2 }
 0xc2e   : > { %2856 = vmatprep.subr.bf16.mxu0 %v3035_v2 }
 0xc34   : > { %2847 = vmatmul.mubr.msk.bf16.vlgmr.msra.gmra.mrb[48].mxu0 %vm717_vm4, %v1983_v19 }
 0xc35   : > { %2860 = vmatprep.mubr.msk.bf16.mxu0 %vm3036_vm0, %v3035_v2 }
 0xc84   : > { %v1691_v20 = vpop.f32.mrb[36].mxu0 }
 0xc85   : > { %v1697_v21 = vsel %vm3249_vm6, %v1691_v20, -1e+30  ;;  %v2812_v22 = vpop.f32.mrb[37].mxu0 }
 0xc86   : > { %v1694_v23 = vpop.f32.mrb[38].mxu0  ;;  %v1698_v24 = vsel %vm717_vm4, %v1697_v21, -inf }
 0xc87   : > { %1699 = vmax.xlane.f32.xlu0 %v1698_v24  ;;  %v2813_v26 = vpop.f32.mrb[39].mxu0 }
 0xcf7   : > { %v1803_v27 = vpop.f32.mrb[40].mxu0 }
 0xcf8   : > { %v1809_v28 = vsel %vm3249_vm6, %v1803_v27, -1e+30  ;;  %v2824_v29 = vpop.f32.mrb[41].mxu0 }
 0xcf9   : > { %v1806_v30 = vpop.f32.mrb[42].mxu0  ;;  %v1810_v31 = vsel %vm717_vm4, %v1809_v28, -inf }
 0xcfa   : > { %1811 = vmax.xlane.f32.xlu1 %v1810_v31  ;;  %v2825_v32 = vpop.f32.mrb[43].mxu0  ;;  %v2958_v30 = vld [vmem:[%s3591_s6 + $0x10] sm:$0xff]  }
 0xcfb   : > { %2857 = vmatpush3.bf16.msra.mxu0 %v2958_v30 }
 0xcfc   : > { %2858 = vmatprep.subr.bf16.mxu0 %v3035_v2 }
 0xcff   : > { %v1915_v33 = vpop.f32.mrb[44].mxu0 }
 0xd00   : > { %v1921_v34 = vsel %vm3249_vm6, %v1915_v33, -1e+30  ;;  %v2836_v35 = vpop.f32.mrb[45].mxu0 }
 0xd01   : > { %v1918_v38 = vpop.f32.mrb[46].mxu0  ;;  %v1922_v39 = vsel %vm717_vm4, %v1921_v34, -inf }
 0xd02   : > { %1923 = vmax.xlane.f32.xlu0 %v1922_v39  ;;  %v2837_v40 = vpop.f32.mrb[47].mxu0 }
 0xd07   : > { %v2026_v41 = vpop.f32.mrb[48].mxu0 }
 0xd08   : > { %v2032_v42 = vsel %vm3249_vm6, %v2026_v41, -1e+30  ;;  %v2848_v43 = vpop.f32.mrb[49].mxu0 }
 0xd09   : > { %v2029_v44 = vpop.f32.mrb[50].mxu0  ;;  %v2033_v45 = vsel %vm717_vm4, %v2032_v42, -inf }
 0xd0a   : > { %2034 = vmax.xlane.f32.xlu0 %v2033_v45  ;;  %v2849_v46 = vpop.f32.mrb[51].mxu0 }
 0xd14   : > { %v1700_v47 = vpop.xlane.xlu0 %1699 }
 0xd15   : > { %v1701_v48 = vsub.f32 %v1697_v21, %v1700_v47 }
 0xd17   : > { %v1702_v49 = vmul.f32 1.442695, %v1701_v48 }
 0xd19   : > { %3002 = vpow2.f32 %v1702_v49 }
 0xd23   : > { %v3003_v50 = vpop.eup %3002 }
 0xd24   : > { %v1704_v51 = vsel %vm717_vm4, %v3003_v50, 0.0 }
 0xd25   : > { %1705 = vadd.xlane.f32.xlu1 %v1704_v51 }
 0xd36   : > { %1823 = vrot.lane.b32.xlu1 %v3417_v56, %s3037_s13 }
 0xd87   : > { %v1812_v53 = vpop.xlane.xlu1 %1811 }
 0xd88   : > { %v1813_v11 = vsub.f32 %v1809_v28, %v1812_v53 }
 0xd8a   : > { %v1814_v54 = vmul.f32 1.442695, %v1813_v11 }
 0xd8c   : > { %3004 = vpow2.f32 %v1814_v54 }
 0xd8f   : > { %v1924_v55 = vpop.xlane.xlu0 %1923 }
 0xd90   : > { %v1925_v12 = vsub.f32 %v1921_v34, %v1924_v55 }
 0xd92   : > { %v1926_v57 = vmul.f32 1.442695, %v1925_v12 }
 0xd94   : > { %3006 = vpow2.f32 %v1926_v57 }
 0xd96   : > { %v3005_v58 = vpop.eup %3004 }
 0xd97   : > { %v2035_v59 = vpop.xlane.xlu0 %2034  ;;  %v1816_v60 = vsel %vm717_vm4, %v3005_v58, 0.0 }
 0xd98   : > { %v2036_v61 = vsub.f32 %v2032_v42, %v2035_v59  ;;  %1817 = vadd.xlane.f32.xlu0 %v1816_v60  ;;  %v2962_v59 = vld [vmem:[%s3593_s8 + $0x24] ss:$8 sps:$4 sm:$0xff]   ;;  %v2960_v60 = vld [vmem:[%s3593_s8 + $0x20] ss:$8 sps:$4 sm:$0xff]  }
 0xd9a   : > { %v2037_v62 = vmul.f32 1.442695, %v2036_v61  ;;  %v2965_v61 = vld [vmem:[%s3593_s8 + $0x34] ss:$8 sps:$4 sm:$0xff]  }
 0xd9c   : > { %3008 = vpow2.f32 %v2037_v62 }
 0xd9e   : > { %v3007_v63 = vpop.eup %3006 }
 0xd9f   : > { %v1928_v0 = vsel %vm717_vm4, %v3007_v63, 0.0 }
 0xda0   : > { %1929 = vadd.xlane.f32.xlu1 %v1928_v0 }
 0xda6   : > { %v3009_v3 = vpop.eup %3008 }
 0xda7   : > { %v2039_v4 = vsel %vm717_vm4, %v3009_v3, 0.0 }
 0xda8   : > { %2040 = vadd.xlane.f32.xlu0 %v2039_v4  ;;  %v2594_v4 = vld [vmem:[%s3592_s7 + $0x1] ss:$0 sm:$0xff] }
 0xdb1   : > { %2045 = vrot.lane.b32.xlu1 %v3417_v56, %s3039_s15 }
 0xdb2   : > { %v1706_v5 = vpop.xlane.xlu1 %1705 }
 0xdb3   : > { %3010 = vrcp.f32 %v1706_v5 }
 0xdb6   : > { %v1824_v9 = vpop.permute.xlu1 %1823 }
 0xdb7   : > { %v1829_v13 = vsel %vm781_vm5, %v1824_v9, 0  ;;  %v2966_v9 = vld [vmem:[%s3594_s9 + $0x40] sm:$0xff]  }
 0xdbd   : > { %v3011_v6 = vpop.eup %3010 }
 0xdbe   : > { %v1708_v52 = vmul.f32 %v3011_v6, %v3003_v50  ;;  %1934 = vrot.lane.b32.xlu0 %v3417_v56, %s3038_s14 }
 0xdc0   : > { %v1709_v10 = vpack.c.bf16 %v1708_v52, %v1708_v52 }
 0xdc2   : > { %2817 = vmatmul.mubr.msk.bf16.vlgmr.msra.gmra.mrb[36].mxu1 %vm717_vm4, %v1709_v10  ;;  %v2967_v10 = vld [vmem:[%s3594_s9 + $0x48] sm:$0xff]  }
 0xdc3   : > { %2827 = vmatpush3.bf16.msra.mxu1 %v1829_v13  ;;  %2828 = vmatprep.mubr.msk.bf16.mxu1 %vm3036_vm0, %v3035_v2  ;;  %v2968_v13 = vld [vmem:[%s3594_s9 + $0x50] sm:$0xff]  }
 0xdc4   : > { %2838 = vmatprep.subr.bf16.mxu1 %v3035_v2 }
 0xe25   : > { %v1818_v14 = vpop.xlane.xlu0 %1817 }
 0xe26   : > { %3012 = vrcp.f32 %v1818_v14  ;;  %v2969_v14 = vld [vmem:[%s3594_s9 + $0x58] sm:$0xff]  }
 0xe2d   : > { %v1930_v36 = vpop.xlane.xlu1 %1929 }
 0xe2e   : > { %3014 = vrcp.f32 %v1930_v36  ;;  %v2970_v36 = vld [vmem:[%s3594_s9 + $0x60] sm:$0xff]  }
 0xe30   : > { %v3013_v37 = vpop.eup %3012 }
 0xe31   : > { %v1820_v15 = vmul.f32 %v3013_v37, %v3005_v58  ;;  %v2046_v19 = vpop.permute.xlu1 %2045  ;;  %v2971_v37 = vld [vmem:[%s3594_s9 + $0x68] sm:$0xff]  }
 0xe32   : > { %v2051_v21 = vsel %vm781_vm5, %v2046_v19, 0 }
 0xe33   : > { %v1821_v16 = vpack.c.bf16 %v1820_v15, %v1820_v15  ;;  %v2972_v15 = vld [vmem:[%s3594_s9 + $0x70] sm:$0xff]  }
 0xe35   : > { %2829 = vmatmul.mubr.msk.bf16.vlgmr.msra.gmra.mrb[40].mxu1 %vm717_vm4, %v1821_v16  ;;  %v2041_v56 = vpop.xlane.xlu0 %2040  ;;  %v2973_v16 = vld [vmem:[%s3594_s9 + $0x78] sm:$0xff]  }
 0xe36   : > { %3016 = vrcp.f32 %v2041_v56  ;;  %2840 = vmatprep.mubr.msk.bf16.mxu1 %vm3036_vm0, %v3035_v2 }
 0xe38   : > { %v3015_v17 = vpop.eup %3014 }
 0xe39   : > { %v1932_v18 = vmul.f32 %v3015_v17, %v3007_v63  ;;  %v1935_v7 = vpop.permute.xlu0 %1934 }
 0xe3a   : > { %v1940_v8 = vsel %vm781_vm5, %v1935_v7, 0 }
 0xe3b   : > { %2839 = vmatpush3.bf16.msra.mxu1 %v1940_v8  ;;  %v1933_v20 = vpack.c.bf16 %v1932_v18, %v1932_v18 }
 0xe3c   : > { %2850 = vmatprep.subr.bf16.mxu1 %v3035_v2 }
 0xe3e   : > { %2841 = vmatmul.mubr.msk.bf16.vlgmr.msra.gmra.mrb[44].mxu1 %vm717_vm4, %v1933_v20 }
 0xe3f   : > { %2851 = vmatpush3.bf16.msra.mxu1 %v2051_v21  ;;  %2852 = vmatprep.mubr.msk.bf16.mxu1 %vm3036_vm0, %v3035_v2 }
 0xe40   : > { %v3017_v22 = vpop.eup %3016  ;;  %2215 = vmatprep.subr.bf16.mxu1 %v2962_v59 }
 0xe41   : > { %v2043_v23 = vmul.f32 %v3017_v22, %v3009_v3 }
 0xe43   : > { %v2044_v24 = vpack.c.bf16 %v2043_v23, %v2043_v23 }
 0xe46   : > { %2853 = vmatmul.mubr.msk.bf16.vlgmr.msra.gmra.mrb[48].mxu1 %vm717_vm4, %v2044_v24 }
 0xe47   : > { %2247 = vmatprep.mubr.bf16.mxu1 %v3034_v1  ;;  %v2959_v1 = vld [vmem:[%s3591_s6 + $0x18] sm:$0xff]   ;;  %2216 = vmatpush1.bf16.msra.mxu1 %v2960_v60 }
 0xe48   : > { %2859 = vmatpush3.bf16.msra.mxu0 %v2959_v1  ;;  %2217 = vmatprep.subr.bf16.mxu1 %v2965_v61  ;;  %v2975_v1 = vld [vmem:[%s3596_s11 + $0x8] sm:$0xff]  }
 0xe49   : > { %2864 = vmatprep.subr.bf16.mxu0 %v3035_v2 }
 0xe95   : > { %v1751_v26 = vpop.f32.mrb[36].mxu1 }
 0xe96   : > { %v2818_v27 = vpop.f32.mrb[37].mxu1 }
 0xe97   : > { %v1754_v28 = vpop.f32.mrb[38].mxu1 }
 0xe98   : > { %v2819_v29 = vpop.f32.mrb[39].mxu1 }
 0xf08   : > { %v1865_v31 = vpop.f32.mrb[40].mxu1 }
 0xf09   : > { %2094 = vrot.lane.b32.xlu1 %v1865_v31, %s3040_s18  ;;  %v2830_v32 = vpop.f32.mrb[41].mxu1  ;;  %s3601_s18 = sshll.u32 %s3603_s22, 3 }
 0xf0a   : > { %v1868_v33 = vpop.f32.mrb[42].mxu1  ;;  %s408_s28 = scalar_lea.vmem %s3597_s12, %s3601_s18 }
 0xf0b   : > { %v2831_v34 = vpop.f32.mrb[43].mxu1 }
 0xf0c   : > { %v2974_v34 = vld [vmem:[%s3596_s11] sm:$0xff]  }
 0xf11   : > { %v1976_v35 = vpop.f32.mrb[44].mxu1 }
 0xf12   : > { %2098 = vrot.lane.b32.xlu0 %v1976_v35, %s3041_s23  ;;  %v2842_v38 = vpop.f32.mrb[45].mxu1 }
 0xf13   : > { %v1979_v39 = vpop.f32.mrb[46].mxu1 }
 0xf14   : > { %v2843_v40 = vpop.f32.mrb[47].mxu1 }
 0xf19   : > { %v2087_v41 = vpop.f32.mrb[48].mxu1 }
 0xf1a   : > { %2102 = vrot.lane.b32.xlu1 %v2087_v41, %s3042_s24  ;;  %v2854_v42 = vpop.f32.mrb[49].mxu1  ;;  %v2628_v41 = vld [vmem:[%s3595_s10] ss:$0 sm:$0xff] }
 0xf1b   : > { %v2090_v43 = vpop.f32.mrb[50].mxu1 }
 0xf1c   : > { %v2855_v44 = vpop.f32.mrb[51].mxu1 }
 0xf7b   : > { %v2095_v45 = vpop.permute.xlu1 %2094 }
 0xf7c   : > { %v2105_v47 = vsel %vm717_vm4, %v1751_v26, %v2095_v45 }
 0xf84   : > { %v2099_v46 = vpop.permute.xlu0 %2098 }
 0xf85   : > { %v2106_v48 = vsel %vm1174_vm7, %v2105_v47, %v2099_v46 }
 0xf8c   : > { %v2103_v49 = vpop.permute.xlu1 %2102 }
 0xf8d   : > { %v2107_v50 = vsel %vm1176_vm8, %v2106_v48, %v2103_v49 }
 0xf8e   : > { %v2113_v51 = vpack.c.bf16 %v2107_v50, %v2107_v50 }
 0xf90   : > { %2861 = vmatmul.mubr.msk.bf16.vlgmr.msra.gmra.mrb[52].mxu0 %vm503_vm3, %v2113_v51 }
 0xf91   : > { %2880 = vmatprep.mubr.msk.bf16.mxu0 %vm3036_vm0, %v3035_v2  ;;  %2865 = vmatpush3.bf16.msra.mxu0 %v2966_v9 }
 0xf92   : > { %2866 = vmatprep.subr.bf16.mxu0 %v3035_v2 }
 0xf95   : > { %2867 = vmatpush3.bf16.msra.mxu0 %v2967_v10 }
 0xf96   : > { %2868 = vmatprep.subr.bf16.mxu0 %v3035_v2 }
 0xf99   : > { %2869 = vmatpush3.bf16.msra.mxu0 %v2968_v13 }
 0xf9a   : > { %2870 = vmatprep.subr.bf16.mxu0 %v3035_v2 }
 0xf9d   : > { %2871 = vmatpush3.bf16.msra.mxu0 %v2969_v14 }
 0xf9e   : > { %2872 = vmatprep.subr.bf16.mxu0 %v3035_v2 }
 0xfa1   : > { %2873 = vmatpush3.bf16.msra.mxu0 %v2970_v36 }
 0xfa2   : > { %2874 = vmatprep.subr.bf16.mxu0 %v3035_v2 }
 0xfa5   : > { %2875 = vmatpush3.bf16.msra.mxu0 %v2971_v37 }
 0xfa6   : > { %2876 = vmatprep.subr.bf16.mxu0 %v3035_v2 }
 0xfa9   : > { %2877 = vmatpush3.bf16.msra.mxu0 %v2972_v15 }
 0xfaa   : > { %2878 = vmatprep.subr.bf16.mxu0 %v3035_v2 }
 0xfad   : > { %2879 = vmatpush3.bf16.msra.mxu0 %v2973_v16 }
0x1063   : > { %v2163_v53 = vpop.f32.mrb[52].mxu0 }
0x1064   : > { %v3508_v11 = vadd.f32 %v2163_v53, %v3367_v25  ;;  %v2862_v54 = vpop.f32.mrb[53].mxu0  ;;  %v2963_v25 = vld [vmem:[%s3593_s8 + $0x30] ss:$8 sps:$4 sm:$0xff]  }
0x1065   : > { %v2166_v55 = vpop.f32.mrb[54].mxu0  ;;  %2218 = vmatpush1.bf16.msra.mxu1 %v2963_v25 }
0x1066   : > { %v2863_v12 = vpop.f32.mrb[55].mxu0  ;;  %v2171_v57 = vmul.f32 %v3508_v11, %v3508_v11  ;;  %2884 = vmatprep.subr.bf16.mxu1 %v3035_v2 }
0x1068   : > { %v2172_v58 = vsel %vm503_vm3, %v2171_v57, 0.0 }
0x1069   : > { %2173 = vadd.xlane.f32.xlu0 %v2172_v58 }
0x10f6   : > { %v2174_v62 = vpop.xlane.xlu0 %2173 }
0x10f7   : > { %v2175_v63 = vmul.f32 0.03125, %v2174_v62 }
0x10f9   : > { %v2176_v0 = vadd.f32 1e-06, %v2175_v63 }
0x10fb   : > { %3018 = vrsqrt.f32 %v2176_v0 }
0x1105   : > { %v3019_v3 = vpop.eup %3018 }
0x1106   : > { %v2178_v5 = vmul.f32 %v3019_v3, %v3508_v11 }
0x1108   : > { %v2185_v6 = vmul.f32 %v2594_v4, %v2178_v5 }
0x110a   : > { %v2191_v52 = vpack.c.bf16 %v2185_v6, %v2185_v6 }
0x110c   : > { %2603 = vmatmul.mubr.msk.bf16.vlgmr.msra.gmra.mrb[52].mxu1 %vm503_vm3, %v2191_v52 }
0x110d   : > { %2888 = vmatprep.mubr.msk.bf16.mxu1 %vm3036_vm0, %v3035_v2  ;;  %2885 = vmatpush3.bf16.msra.mxu1 %v2974_v34 }
0x110e   : > { %2886 = vmatprep.subr.bf16.mxu1 %v3035_v2 }
0x1111   : > { %2887 = vmatpush3.bf16.msra.mxu1 %v2975_v1 }
0x11df   : > { %v2249_v56 = vpop.f32.mrb[52].mxu1 }
0x11e0   : > { %v2256_v17 = vsub.f32 0.0, %v2249_v56  ;;  %v2251_v18 = vpop.f32.mrb[53].mxu1 }
0x11e1   : > { %v2253_v7 = vpop.f32.mrb[54].mxu1 }
0x11e2   : > { %v2257_v8 = vmul.f32 1.442695, %v2256_v17  ;;  %v2254_v19 = vpop.f32.mrb[55].mxu1 }
0x11e4   : > { %3020 = vpow2.f32 %v2257_v8 }
0x11ee   : > { %v3021_v20 = vpop.eup %3020 }
0x11ef   : > { %v2259_v21 = vadd.f32 1.0, %v3021_v20 }
0x11f1   : > { %3022 = vrcp.f32 %v2259_v21 }
0x11fb   : > { %v3023_v22 = vpop.eup %3022 }
0x11fc   : > { %v2261_v23 = vmul.f32 %v3023_v22, %v2249_v56 }
0x11fe   : > { %v2262_v24 = vmul.f32 %v2261_v23, %v2251_v18 }
0x1200   : > { %v2280_v26 = vpack.c.bf16 %v2262_v24, %v2262_v24 }
0x1202   : > { %2881 = vmatmul.mubr.bf16.vlgmr.msra.gmra.mrb[56].mxu0 %v2280_v26 }
0x12d5   : > { %v2363_v27 = vpop.f32.mrb[56].mxu0 }
0x12d6   : > { %v2364_v28 = vadd.f32 %v2363_v27, %v3508_v11  ;;  %v2882_v29 = vpop.f32.mrb[57].mxu0 }
0x12d7   : > { %v2366_v30 = vpop.f32.mrb[58].mxu0 }
0x12d8   : > { %v2883_v31 = vpop.f32.mrb[59].mxu0  ;;  %v2370_v32 = vmul.f32 %v2364_v28, %v2364_v28 }
0x12da   : > { %v2371_v33 = vsel %vm503_vm3, %v2370_v32, 0.0 }
0x12db   : > { %2372 = vadd.xlane.f32.xlu1 %v2371_v33 }
0x1368   : > { %v2373_v35 = vpop.xlane.xlu1 %2372 }
0x1369   : > { %v2374_v38 = vmul.f32 0.03125, %v2373_v35 }
0x136b   : > { %v2375_v39 = vadd.f32 1e-06, %v2374_v38 }
0x136d   : > { %3024 = vrsqrt.f32 %v2375_v39 }
0x1377   : > { %v3025_v40 = vpop.eup %3024 }
0x1378   : > { %v2377_v42 = vmul.f32 %v3025_v40, %v2364_v28 }
0x137a   : > { %v2384_v43 = vmul.f32 %v2628_v41, %v2377_v42 }
0x137c   : > { %v2389_v44 = vpack.c.bf16 %v2384_v43, %v2384_v43 }
0x137e   : > { %2889 = vmatmul.mubr.msk.bf16.vlgmr.msra.gmra.mrb[56].mxu1 %vm503_vm3, %v2389_v44 }
0x1451   : > { %v2439_v2 = vpop.f32.mrb[56].mxu1 }
0x1452   : > { %2445 = vst [vmem:[%s408_s28] sm:$0xff] %v2439_v2  ;;  %v2890_v45 = vpop.f32.mrb[57].mxu1 }
0x1453   : > { %v2442_v46 = vpop.f32.mrb[58].mxu1 }
0x1454   : > { %v2891_v47 = vpop.f32.mrb[59].mxu1 }
0x1455 PF: > { %s22_s21 = sadd.s32 1, %s3032_s21  }
0x1456   : > { %p19_p4 = scmp.ge.s32.totalorder %s22_s21, 4  }
0x1458   :  { %21 = sbr.rel (!%p19_p4) target bundleno = 1 (0x1), region = 104 }

</bundles_post_ra>
